<compile_context>
chip_gen: v6e
topology: v6e:2x2x1
jax: 0.10.0
libtpu: 0.0.40
codegen_flags: <defaults>
</compile_context>

<pallas_src>
import functools

import jax
import jax.numpy as jnp
from jax.experimental import pallas as pl
from jax.experimental.pallas import tpu as pltpu


def _pointgencon_kernel(
    x_ref,
    w1_ref, b1_ref,
    w2_ref, b2_ref,
    w3_ref, b3_ref,
    w4_ref, b4_ref,
    o_ref,
):
  cd = w1_ref.dtype                                   # compute dtype (bf16)
  # In-kernel cast: activation arrives in its source dtype (f32 here) and is
  # cast on the VPU, avoiding a separate wrapper-side cast pass over HBM.
  x = x_ref[0].astype(cd)                             # (C0, tn)

  # layer 1: folded conv+BN (scale folded into W) + bias + relu, fused epilogue
  h = jnp.dot(w1_ref[...], x, preferred_element_type=jnp.float32)
  h = jnp.maximum(h + b1_ref[...], 0.0).astype(cd)    # (C0, tn) bf16

  # layer 2
  h = jnp.dot(w2_ref[...], h, preferred_element_type=jnp.float32)
  h = jnp.maximum(h + b2_ref[...], 0.0).astype(cd)    # (C1, tn) bf16

  # layer 3
  h = jnp.dot(w3_ref[...], h, preferred_element_type=jnp.float32)
  h = jnp.maximum(h + b3_ref[...], 0.0).astype(cd)    # (C2, tn) bf16

  # layer 4: output rows padded 3 -> 8 for the MXU, sliced back before tanh.
  h = jnp.dot(w4_ref[...], h, preferred_element_type=jnp.float32)
  o_ref[0] = jnp.tanh(h[:3, :] + b4_ref[...])         # (3, tn) f32


def pointgencon_forward(x_ncw, params, *, tn=2048, compute_dtype=jnp.bfloat16):
  """x_ncw: (B, C0, N) float32 (or bfloat16).  Returns (B, 3, N) float32."""
  B, C0, N = x_ncw.shape
  w1, b1, w2, b2, w3, b3, w4p, b4 = params

  # Lane-tile size: multiple of 128, clamped to the 128-padded N so small
  # problems don't over-pad.  No explicit padding of N: Pallas masks the
  # ragged last tile's loads/stores at the array boundary.
  tn = max(128, (tn // 128) * 128)
  n128 = pl.cdiv(N, 128) * 128
  tn = min(tn, n128)
  if B == 1 and n128 > 128:
    # Keep >= 2 lane tiles so both v7x TensorCores get parallel grid steps.
    tn = min(tn, pl.cdiv(pl.cdiv(N, 2), 128) * 128)

  w1c, w2c, w3c, w4c = (w.astype(compute_dtype) for w in (w1, w2, w3, w4p))

  def const_spec(arr):
    nd = arr.ndim
    return pl.BlockSpec(arr.shape, lambda b, n: (0,) * nd)

  out = pl.pallas_call(
      _pointgencon_kernel,
      out_shape=jax.ShapeDtypeStruct((B, 3, N), jnp.float32),
      grid_spec=pltpu.PrefetchScalarGridSpec(
          num_scalar_prefetch=0,
          grid=(B, pl.cdiv(N, tn)),
          in_specs=[
              pl.BlockSpec((1, C0, tn), lambda b, n: (b, 0, n)),
              const_spec(w1c), const_spec(b1),
              const_spec(w2c), const_spec(b2),
              const_spec(w3c), const_spec(b3),
              const_spec(w4c), const_spec(b4),
          ],
          out_specs=pl.BlockSpec((1, 3, tn), lambda b, n: (b, 0, n)),
      ),
      compiler_params=pltpu.CompilerParams(
          dimension_semantics=("parallel", "parallel")),
  )(x_ncw, w1c, b1, w2c, b2, w3c, b3, w4c, b4)

  return out


def make_params(key, bottleneck_size):
  """Deterministic parameters matching PointGenCon's shapes (eval-mode BN).

  Conv1d(kernel=1) weights are (C_out, C_in); the BatchNorm affine is folded
  directly into the weights and a per-channel shift:
      y = (W @ x + b - mean) / sqrt(var + eps) * gamma + beta
        = (scale[:, None] * W) @ x + ((b - mean) * scale + beta)
  The last conv has no BN; its output rows are zero-padded 3 -> 8.
  """
  assert bottleneck_size % 4 == 0
  C0 = bottleneck_size
  C1 = C0 // 2
  C2 = C0 // 4
  eps = 1e-5

  ki = iter(jax.random.split(key, 16))

  def conv_wb(cin, cout):
    # PyTorch Conv1d default init: U(-1/sqrt(cin), 1/sqrt(cin)); kernel=1.
    bound = cin ** -0.5
    w = jax.random.uniform(next(ki), (cout, cin), jnp.float32, -bound, bound)
    b = jax.random.uniform(next(ki), (cout,), jnp.float32, -bound, bound)
    return w, b

  def bn_fold(w, b, cout):
    gamma = 1.0 + 0.1 * jax.random.normal(next(ki), (cout,), jnp.float32)
    beta = 0.1 * jax.random.normal(next(ki), (cout,), jnp.float32)
    mean = jnp.zeros((cout,), jnp.float32)
    var = jnp.ones((cout,), jnp.float32)
    scale = gamma / jnp.sqrt(var + eps)
    w_f = w * scale[:, None]
    b_f = (b - mean) * scale + beta
    return w_f, b_f.reshape(cout, 1)

  w1r, b1r = conv_wb(C0, C0); w1, b1 = bn_fold(w1r, b1r, C0)
  w2r, b2r = conv_wb(C0, C1); w2, b2 = bn_fold(w2r, b2r, C1)
  w3r, b3r = conv_wb(C1, C2); w3, b3 = bn_fold(w3r, b3r, C2)
  w4r, b4r = conv_wb(C2, 3)
  w4p = jnp.zeros((8, C2), jnp.float32).at[:3, :].set(w4r)   # pad rows 3 -> 8
  b4 = b4r.reshape(3, 1)

  return (w1, b1, w2, b2, w3, b3, w4p, b4)


def reference_forward(x_ncw, params, compute_dtype=jnp.bfloat16):
  """Pure-JAX reference with identical numerics (bf16 matmuls, f32 accumulate)."""
  w1, b1, w2, b2, w3, b3, w4p, b4 = params
  cd = compute_dtype

  def mm(w, h):
    return jnp.einsum("oc,bcn->bon", w.astype(cd), h.astype(cd),
                      preferred_element_type=jnp.float32)

  h = jnp.maximum(mm(w1, x_ncw) + b1[None], 0.0)
  h = jnp.maximum(mm(w2, h) + b2[None], 0.0)
  h = jnp.maximum(mm(w3, h) + b3[None], 0.0)
  return jnp.tanh(mm(w4p, h)[:, :3, :] + b4[None])


if __name__ == "__main__":
  # Small shapes consistent with the module; N is deliberately NOT a multiple
  # of 128 to exercise Pallas boundary masking on the ragged last lane tile.
  B, N = 2, 200
  BOTTLENECK = 256

  key = jax.random.PRNGKey(0)
  k_x, k_p = jax.random.split(key)
  x = jax.random.normal(k_x, (B, BOTTLENECK, N), jnp.float32)
  params = make_params(k_p, BOTTLENECK)

  fwd = jax.jit(functools.partial(pointgencon_forward, tn=2048))
  out = fwd(x, params)
  jax.block_until_ready(out)

  assert out.shape == (B, 3, N), out.shape
  ref = reference_forward(x, params)
  err = float(jnp.max(jnp.abs(out - ref)))
  assert jnp.allclose(out, ref, atol=5e-4, rtol=5e-4), err

  print("KERNEL_OK")
</pallas_src>

<mosaic_0001>
module attributes {stable_mosaic.version = 11 : i64} {
  func.func @_pointgencon_kernel(%arg0: i32, %arg1: i32, %arg2: memref<1x256x256xf32, #tpu.memory_space<vmem>>, %arg3: memref<256x256xbf16, #tpu.memory_space<vmem>>, %arg4: memref<256x1xf32, #tpu.memory_space<vmem>>, %arg5: memref<128x256xbf16, #tpu.memory_space<vmem>>, %arg6: memref<128x1xf32, #tpu.memory_space<vmem>>, %arg7: memref<64x128xbf16, #tpu.memory_space<vmem>>, %arg8: memref<64x1xf32, #tpu.memory_space<vmem>>, %arg9: memref<8x64xbf16, #tpu.memory_space<vmem>>, %arg10: memref<3x1xf32, #tpu.memory_space<vmem>>, %arg11: memref<1x3x256xf32, #tpu.memory_space<vmem>>) attributes {dimension_semantics = [#tpu.dimension_semantics<parallel>, #tpu.dimension_semantics<parallel>], iteration_bounds = array<i64: 2, 1>, scalar_prefetch = 0 : i64, scratch_operands = 0 : i64, tpu.core_type = #tpu.core_type<tc>, window_params = [{transform_indices = @transform_0, window_bounds = array<i64: 1, 256, 256>}, {pipeline_mode = #tpu.pipeline_mode<synchronous>, transform_indices = @transform_1, window_bounds = array<i64: 256, 256>}, {pipeline_mode = #tpu.pipeline_mode<synchronous>, transform_indices = @transform_2, window_bounds = array<i64: 256, 1>}, {pipeline_mode = #tpu.pipeline_mode<synchronous>, transform_indices = @transform_3, window_bounds = array<i64: 128, 256>}, {pipeline_mode = #tpu.pipeline_mode<synchronous>, transform_indices = @transform_4, window_bounds = array<i64: 128, 1>}, {pipeline_mode = #tpu.pipeline_mode<synchronous>, transform_indices = @transform_5, window_bounds = array<i64: 64, 128>}, {pipeline_mode = #tpu.pipeline_mode<synchronous>, transform_indices = @transform_6, window_bounds = array<i64: 64, 1>}, {pipeline_mode = #tpu.pipeline_mode<synchronous>, transform_indices = @transform_7, window_bounds = array<i64: 8, 64>}, {pipeline_mode = #tpu.pipeline_mode<synchronous>, transform_indices = @transform_8, window_bounds = array<i64: 3, 1>}, {transform_indices = @transform_9, window_bounds = array<i64: 1, 3, 256>}]} {
    %c0 = arith.constant 0 : index
    %c0_0 = arith.constant 0 : index
    %c0_1 = arith.constant 0 : index
    %0 = vector.load %arg2[%c0, %c0_0, %c0_1] : memref<1x256x256xf32, #tpu.memory_space<vmem>>, vector<1x256x256xf32>
    %1 = vector.shape_cast %0 : vector<1x256x256xf32> to vector<256x256xf32>
    %2 = arith.truncf %1 : vector<256x256xf32> to vector<256x256xbf16>
    %c0_2 = arith.constant 0 : index
    %c0_3 = arith.constant 0 : index
    %3 = vector.load %arg3[%c0_2, %c0_3] : memref<256x256xbf16, #tpu.memory_space<vmem>>, vector<256x256xbf16>
    %cst = arith.constant dense<0.000000e+00> : vector<256x256xf32>
    %4 = tpu.matmul %3, %2, %cst {dimension_numbers = #tpu.dot_dimension_numbers<[1], [0], [0], [1], [0, 0, 1, 1], [], []>} : vector<256x256xbf16>, vector<256x256xbf16>, vector<256x256xf32> -> vector<256x256xf32>
    %c0_4 = arith.constant 0 : index
    %c0_5 = arith.constant 0 : index
    %5 = vector.load %arg4[%c0_4, %c0_5] : memref<256x1xf32, #tpu.memory_space<vmem>>, vector<256x1xf32>
    %6 = vector.broadcast %5 : vector<256x1xf32> to vector<256x256xf32>
    %7 = arith.addf %4, %6 : vector<256x256xf32>
    %cst_6 = arith.constant 0.000000e+00 : f32
    %8 = vector.broadcast %cst_6 : f32 to vector<256x256xf32>
    %9 = arith.maximumf %7, %8 : vector<256x256xf32>
    %10 = arith.truncf %9 : vector<256x256xf32> to vector<256x256xbf16>
    %c0_7 = arith.constant 0 : index
    %c0_8 = arith.constant 0 : index
    %11 = vector.load %arg5[%c0_7, %c0_8] : memref<128x256xbf16, #tpu.memory_space<vmem>>, vector<128x256xbf16>
    %cst_9 = arith.constant dense<0.000000e+00> : vector<128x256xf32>
    %12 = tpu.matmul %11, %10, %cst_9 {dimension_numbers = #tpu.dot_dimension_numbers<[1], [0], [0], [1], [0, 0, 1, 1], [], []>} : vector<128x256xbf16>, vector<256x256xbf16>, vector<128x256xf32> -> vector<128x256xf32>
    %c0_10 = arith.constant 0 : index
    %c0_11 = arith.constant 0 : index
    %13 = vector.load %arg6[%c0_10, %c0_11] : memref<128x1xf32, #tpu.memory_space<vmem>>, vector<128x1xf32>
    %14 = vector.broadcast %13 : vector<128x1xf32> to vector<128x256xf32>
    %15 = arith.addf %12, %14 : vector<128x256xf32>
    %cst_12 = arith.constant 0.000000e+00 : f32
    %16 = vector.broadcast %cst_12 : f32 to vector<128x256xf32>
    %17 = arith.maximumf %15, %16 : vector<128x256xf32>
    %18 = arith.truncf %17 : vector<128x256xf32> to vector<128x256xbf16>
    %c0_13 = arith.constant 0 : index
    %c0_14 = arith.constant 0 : index
    %19 = vector.load %arg7[%c0_13, %c0_14] : memref<64x128xbf16, #tpu.memory_space<vmem>>, vector<64x128xbf16>
    %cst_15 = arith.constant dense<0.000000e+00> : vector<64x256xf32>
    %20 = tpu.matmul %19, %18, %cst_15 {dimension_numbers = #tpu.dot_dimension_numbers<[1], [0], [0], [1], [0, 0, 1, 1], [], []>} : vector<64x128xbf16>, vector<128x256xbf16>, vector<64x256xf32> -> vector<64x256xf32>
    %c0_16 = arith.constant 0 : index
    %c0_17 = arith.constant 0 : index
    %21 = vector.load %arg8[%c0_16, %c0_17] : memref<64x1xf32, #tpu.memory_space<vmem>>, vector<64x1xf32>
    %22 = vector.broadcast %21 : vector<64x1xf32> to vector<64x256xf32>
    %23 = arith.addf %20, %22 : vector<64x256xf32>
    %cst_18 = arith.constant 0.000000e+00 : f32
    %24 = vector.broadcast %cst_18 : f32 to vector<64x256xf32>
    %25 = arith.maximumf %23, %24 : vector<64x256xf32>
    %26 = arith.truncf %25 : vector<64x256xf32> to vector<64x256xbf16>
    %c0_19 = arith.constant 0 : index
    %c0_20 = arith.constant 0 : index
    %27 = vector.load %arg9[%c0_19, %c0_20] : memref<8x64xbf16, #tpu.memory_space<vmem>>, vector<8x64xbf16>
    %cst_21 = arith.constant dense<0.000000e+00> : vector<8x256xf32>
    %28 = tpu.matmul %27, %26, %cst_21 {dimension_numbers = #tpu.dot_dimension_numbers<[1], [0], [0], [1], [0, 0, 1, 1], [], []>} : vector<8x64xbf16>, vector<64x256xbf16>, vector<8x256xf32> -> vector<8x256xf32>
    %29 = vector.extract_strided_slice %28 {offsets = [0, 0], sizes = [3, 256], strides = [1, 1]} : vector<8x256xf32> to vector<3x256xf32>
    %c0_22 = arith.constant 0 : index
    %c0_23 = arith.constant 0 : index
    %30 = vector.load %arg10[%c0_22, %c0_23] : memref<3x1xf32, #tpu.memory_space<vmem>>, vector<3x1xf32>
    %31 = vector.broadcast %30 : vector<3x1xf32> to vector<3x256xf32>
    %32 = arith.addf %29, %31 : vector<3x256xf32>
    %33 = math.tanh %32 : vector<3x256xf32>
    %c0_24 = arith.constant 0 : index
    %c0_25 = arith.constant 0 : index
    %c0_26 = arith.constant 0 : index
    %34 = vector.load %arg11[%c0_24, %c0_25, %c0_26] : memref<1x3x256xf32, #tpu.memory_space<vmem>>, vector<1x3x256xf32>
    %35 = vector.shape_cast %34 : vector<1x3x256xf32> to vector<3x256xf32>
    %36 = vector.shape_cast %33 : vector<3x256xf32> to vector<1x3x256xf32>
    tpu.vector_store %arg11[%c0_24, %c0_25, %c0_26], %36 {strides = array<i32>} : memref<1x3x256xf32, #tpu.memory_space<vmem>>, vector<1x3x256xf32>,
    return
  }
  func.func @transform_0(%arg0: i32, %arg1: i32) -> (i32, i32, i32) {
    %c0_i32 = arith.constant 0 : i32
    %c0_i32_0 = arith.constant 0 : i32
    return %arg0, %c0_i32, %arg1 : i32, i32, i32
  }
  func.func @transform_1(%arg0: i32, %arg1: i32) -> (i32, i32) {
    %c0_i32 = arith.constant 0 : i32
    %c0_i32_0 = arith.constant 0 : i32
    %c0_i32_1 = arith.constant 0 : i32
    return %c0_i32, %c0_i32_0 : i32, i32
  }
  func.func @transform_2(%arg0: i32, %arg1: i32) -> (i32, i32) {
    %c0_i32 = arith.constant 0 : i32
    %c0_i32_0 = arith.constant 0 : i32
    %c0_i32_1 = arith.constant 0 : i32
    return %c0_i32, %c0_i32_0 : i32, i32
  }
  func.func @transform_3(%arg0: i32, %arg1: i32) -> (i32, i32) {
    %c0_i32 = arith.constant 0 : i32
    %c0_i32_0 = arith.constant 0 : i32
    %c0_i32_1 = arith.constant 0 : i32
    return %c0_i32, %c0_i32_0 : i32, i32
  }
  func.func @transform_4(%arg0: i32, %arg1: i32) -> (i32, i32) {
    %c0_i32 = arith.constant 0 : i32
    %c0_i32_0 = arith.constant 0 : i32
    %c0_i32_1 = arith.constant 0 : i32
    return %c0_i32, %c0_i32_0 : i32, i32
  }
  func.func @transform_5(%arg0: i32, %arg1: i32) -> (i32, i32) {
    %c0_i32 = arith.constant 0 : i32
    %c0_i32_0 = arith.constant 0 : i32
    %c0_i32_1 = arith.constant 0 : i32
    return %c0_i32, %c0_i32_0 : i32, i32
  }
  func.func @transform_6(%arg0: i32, %arg1: i32) -> (i32, i32) {
    %c0_i32 = arith.constant 0 : i32
    %c0_i32_0 = arith.constant 0 : i32
    %c0_i32_1 = arith.constant 0 : i32
    return %c0_i32, %c0_i32_0 : i32, i32
  }
  func.func @transform_7(%arg0: i32, %arg1: i32) -> (i32, i32) {
    %c0_i32 = arith.constant 0 : i32
    %c0_i32_0 = arith.constant 0 : i32
    %c0_i32_1 = arith.constant 0 : i32
    return %c0_i32, %c0_i32_0 : i32, i32
  }
  func.func @transform_8(%arg0: i32, %arg1: i32) -> (i32, i32) {
    %c0_i32 = arith.constant 0 : i32
    %c0_i32_0 = arith.constant 0 : i32
    %c0_i32_1 = arith.constant 0 : i32
    return %c0_i32, %c0_i32_0 : i32, i32
  }
  func.func @transform_9(%arg0: i32, %arg1: i32) -> (i32, i32, i32) {
    %c0_i32 = arith.constant 0 : i32
    %c0_i32_0 = arith.constant 0 : i32
    return %arg0, %c0_i32, %arg1 : i32, i32, i32
  }
}

</mosaic_0001>

<bundles_post_ra>
// kernel: pointgencon_forward.1
= control target key start
LH: loop header
LB: loop body
LE: loop exit
PB: predicated region body
PF: predicated region fallthrough
CT: control target
= control target key end

     0   :  { %s2068_s30 = smov 0   ;;  %s2070_s10 = smov 0   ;;  %s2759_s0 = inlined_call_operand.vmem [shape: f32[2,256,200], index: 0, kind: input, shape index: {}]   ;;  %s2760_s1 = inlined_call_operand.vmem [shape: bf16[256,256], index: 1, kind: input, shape index: {}]   ;;  %s2761_s2 = inlined_call_operand.vmem [shape: f32[256,1], index: 2, kind: input, shape index: {}]   ;;  %s2762_s3 = inlined_call_operand.vmem [shape: bf16[128,256], index: 3, kind: input, shape index: {}]   ;;  %s2763_s4 = inlined_call_operand.vmem [shape: f32[128,1], index: 4, kind: input, shape index: {}]   ;;  %s2764_s5 = inlined_call_operand.vmem [shape: bf16[64,128], index: 5, kind: input, shape index: {}]   ;;  %s2765_s6 = inlined_call_operand.vmem [shape: f32[64,1], index: 6, kind: input, shape index: {}]   ;;  %s2766_s7 = inlined_call_operand.vmem [shape: bf16[8,64], index: 7, kind: input, shape index: {}]   ;;  %s2767_s8 = inlined_call_operand.vmem [shape: f32[3,1], index: 8, kind: input, shape index: {}]   ;;  %s2768_s9 = inlined_call_operand.vmem [shape: f32[2,3,200], index: 9, kind: output, shape index: {}]  }
   0x1   :  { %s2072_s11 = smov 0  }
   0x2 LB: > { %s31_s12 = sadd.s32 1, %s2011_s10  ;;  %p1824_p0 = scmp.ge.s32.totalorder %s2015_s11, 1  ;;  %s2015_s11 = sphi %s2072_s11, %s19_s11   ;;  %s2011_s10 = sphi %s2070_s10, %s2791_s10   ;;  %s2007_s30 = sphi %s2068_s30, %s2790_s30  }
   0x3   : > { %p33_p1 = scmp.ge.s32.totalorder %s31_s12, 2  ;;  %p308_p2 = scmp.lt.s32.totalorder %s2015_s11, 3 }
   0x5   : > { %s2793_s12 = smov (%p33_p1, %s31_s12), 0  ;;  %p309_p3 = pnand %p1824_p0, %p308_p2 }
   0x7   : > { %312 = sbr.rel (%p309_p3) target bundleno = 1193 (0x4a9), region = 56 }
   0xc   : > { %p353_p4 = scmp.lt.s32.totalorder %s2007_s30, 1  ;;  %v1915_v0 = vld [vmem:[%s2760_s1 + $0x4] ss:$8 sps:$4 sm:$0xff]   ;;  %v2769_v1 = vmov 0   ;;  %v515_v45 = vld [vmem:[%s2761_s2 + $0x70] sm:$0xff]  ;;  %v516_v51 = vld [vmem:[%s2761_s2 + $0x78] sm:$0xff] }
   0xd   : > { %1911 = vset.pattern.permute.xlu0 %v2769_v1  ;;  %1912 = vset.pattern.permute.xlu1 %v2769_v1  ;;  %v513_v47 = vld [vmem:[%s2761_s2 + $0x60] sm:$0xff]  ;;  %v514_v54 = vld [vmem:[%s2761_s2 + $0x68] sm:$0xff]  ;;  %v511_v60 = vld [vmem:[%s2761_s2 + $0x50] sm:$0xff]  ;;  %vm1673_vm0 = vcmask 523264  }
   0xe   : > { %s2795_s30 = smov (!%p353_p4, %s2007_s30), 1  ;;  %885 = vmatprep.mubr.bf16.mxu0 %v1915_v0  ;;  %605 = vperm.xlu0 %1911, %v515_v45   ;;  %v512_v62 = vld [vmem:[%s2761_s2 + $0x58] sm:$0xff]  ;;  %v531_v45 = vld [vmem:[%s2761_s2 + $0xf0] sm:$0xff] }
   0xf   : > { %s1884_s15 = sshll.u32 %s2795_s30, 9  ;;  %595 = vperm.xlu1 %1912, %v513_v47   ;;  %s1885_s17 = sshll.u32 %s2795_s30, 3 }
  0x10   : > { %s2097_s18 = scalar_lea.vmem %s2759_s0, %s1884_s15  ;;  %s370_s21 = scalar_lea.vmem %s2768_s9, %s1885_s17 }
  0x11   : > { %v402_v2 = vld [vmem:[%s2097_s18 + $0xe8] sm:$0xff]  ;;  %v404_v3 = vld [vmem:[%s2097_s18 + $0xf8] sm:$0xff]  ;;  %v401_v4 = vld [vmem:[%s2097_s18 + $0xe0] sm:$0xff] }
  0x12   : > { %v452_v5 = vpack.c.bf16 %v404_v3, %v402_v2  ;;  %v403_v6 = vld [vmem:[%s2097_s18 + $0xf0] sm:$0xff]  ;;  %v398_v7 = vld [vmem:[%s2097_s18 + $0xc8] sm:$0xff]  ;;  %v400_v8 = vld [vmem:[%s2097_s18 + $0xd8] sm:$0xff]  ;;  %610 = vperm.xlu0 %1911, %v516_v51  }
  0x13   : > { %v451_v9 = vpack.c.bf16 %v403_v6, %v401_v4  ;;  %v450_v10 = vpack.c.bf16 %v400_v8, %v398_v7  ;;  %v397_v11 = vld [vmem:[%s2097_s18 + $0xc0] sm:$0xff]  ;;  %v399_v12 = vld [vmem:[%s2097_s18 + $0xd0] sm:$0xff]  ;;  %v394_v13 = vld [vmem:[%s2097_s18 + $0xa8] sm:$0xff]  ;;  %600 = vperm.xlu1 %1912, %v514_v54  }
  0x14   : > { %853 = vmatprep.subr.bf16.mxu0 %v452_v5  ;;  %v396_v14 = vld [vmem:[%s2097_s18 + $0xb8] sm:$0xff]  ;;  %v449_v15 = vpack.c.bf16 %v399_v12, %v397_v11  ;;  %v393_v17 = vld [vmem:[%s2097_s18 + $0xa0] sm:$0xff]  ;;  %v395_v18 = vld [vmem:[%s2097_s18 + $0xb0] sm:$0xff] }
  0x15   : > { %854 = vmatpush1.bf16.msra.mxu0 %v451_v9  ;;  %v448_v16 = vpack.c.bf16 %v396_v14, %v394_v13  ;;  %v390_v19 = vld [vmem:[%s2097_s18 + $0x88] sm:$0xff]  ;;  %v392_v20 = vld [vmem:[%s2097_s18 + $0x98] sm:$0xff]  ;;  %v447_v21 = vpack.c.bf16 %v395_v18, %v393_v17  ;;  %v389_v23 = vld [vmem:[%s2097_s18 + $0x80] sm:$0xff] }
  0x16   : > { %855 = vmatprep.subr.bf16.mxu0 %v450_v10  ;;  %v446_v22 = vpack.c.bf16 %v392_v20, %v390_v19  ;;  %v391_v24 = vld [vmem:[%s2097_s18 + $0x90] sm:$0xff]  ;;  %v386_v25 = vld [vmem:[%s2097_s18 + $0x68] sm:$0xff]  ;;  %v388_v26 = vld [vmem:[%s2097_s18 + $0x78] sm:$0xff]  ;;  %585 = vperm.xlu0 %1911, %v511_v60  }
  0x17   : > { %v445_v27 = vpack.c.bf16 %v391_v24, %v389_v23  ;;  %v444_v28 = vpack.c.bf16 %v388_v26, %v386_v25  ;;  %v385_v29 = vld [vmem:[%s2097_s18 + $0x60] sm:$0xff]  ;;  %v387_v30 = vld [vmem:[%s2097_s18 + $0x70] sm:$0xff]  ;;  %v382_v31 = vld [vmem:[%s2097_s18 + $0x48] sm:$0xff]  ;;  %590 = vperm.xlu1 %1912, %v512_v62  }
  0x18   : > { %v384_v32 = vld [vmem:[%s2097_s18 + $0x58] sm:$0xff]  ;;  %v443_v33 = vpack.c.bf16 %v387_v30, %v385_v29  ;;  %v381_v35 = vld [vmem:[%s2097_s18 + $0x40] sm:$0xff]  ;;  %v383_v36 = vld [vmem:[%s2097_s18 + $0x50] sm:$0xff] }
  0x19   : > { %856 = vmatpush1.bf16.msra.mxu0 %v449_v15  ;;  %v442_v34 = vpack.c.bf16 %v384_v32, %v382_v31  ;;  %v378_v37 = vld [vmem:[%s2097_s18 + $0x28] sm:$0xff]  ;;  %v380_v38 = vld [vmem:[%s2097_s18 + $0x38] sm:$0xff]  ;;  %v441_v39 = vpack.c.bf16 %v383_v36, %v381_v35  ;;  %v377_v41 = vld [vmem:[%s2097_s18 + $0x20] sm:$0xff] }
  0x1a   : > { %857 = vmatprep.subr.bf16.mxu0 %v448_v16  ;;  %v440_v40 = vpack.c.bf16 %v380_v38, %v378_v37  ;;  %v379_v42 = vld [vmem:[%s2097_s18 + $0x30] sm:$0xff]  ;;  %v374_v43 = vld [vmem:[%s2097_s18 + $0x8] sm:$0xff]  ;;  %v376_v44 = vld [vmem:[%s2097_s18 + $0x18] sm:$0xff] }
  0x1b   : > { %v439_v46 = vpack.c.bf16 %v379_v42, %v377_v41  ;;  %v438_v48 = vpack.c.bf16 %v376_v44, %v374_v43  ;;  %v373_v49 = vld [vmem:[%s2097_s18] sm:$0xff]  ;;  %v375_v50 = vld [vmem:[%s2097_s18 + $0x10] sm:$0xff]  ;;  %v434_v52 = vld [vmem:[%s2097_s18 + $0x1e8] sm:$0xff] }
  0x1c   : > { %v436_v53 = vld [vmem:[%s2097_s18 + $0x1f8] sm:$0xff]  ;;  %v437_v55 = vpack.c.bf16 %v375_v50, %v373_v49  ;;  %v433_v56 = vld [vmem:[%s2097_s18 + $0x1e0] sm:$0xff]  ;;  %v435_v57 = vld [vmem:[%s2097_s18 + $0x1f0] sm:$0xff] }
  0x1d   : > { %858 = vmatpush1.bf16.msra.mxu0 %v447_v21  ;;  %v468_v58 = vpack.c.bf16 %v436_v53, %v434_v52  ;;  %v430_v59 = vld [vmem:[%s2097_s18 + $0x1c8] sm:$0xff]  ;;  %v432_v61 = vld [vmem:[%s2097_s18 + $0x1d8] sm:$0xff]  ;;  %v429_v63 = vld [vmem:[%s2097_s18 + $0x1c0] sm:$0xff]  ;;  %v467_v0 = vpack.c.bf16 %v435_v57, %v433_v56 }
  0x1e   : > { %859 = vmatprep.subr.bf16.mxu0 %v446_v22  ;;  %v431_v2 = vld [vmem:[%s2097_s18 + $0x1d0] sm:$0xff]  ;;  %v466_v3 = vpack.c.bf16 %v432_v61, %v430_v59  ;;  %v426_v4 = vld [vmem:[%s2097_s18 + $0x1a8] sm:$0xff]  ;;  %v428_v5 = vld [vmem:[%s2097_s18 + $0x1b8] sm:$0xff] }
  0x1f   : > { %v509_v6 = vld [vmem:[%s2761_s2 + $0x40] sm:$0xff]  ;;  %v510_v7 = vld [vmem:[%s2761_s2 + $0x48] sm:$0xff]  ;;  %v465_v8 = vpack.c.bf16 %v431_v2, %v429_v63  ;;  %v464_v10 = vpack.c.bf16 %v428_v5, %v426_v4  ;;  %v427_v11 = vld [vmem:[%s2097_s18 + $0x1b0] sm:$0xff] }
  0x20   : > { %v425_v9 = vld [vmem:[%s2097_s18 + $0x1a0] sm:$0xff]  ;;  %575 = vperm.xlu0 %1911, %v509_v6   ;;  %580 = vperm.xlu1 %1912, %v510_v7   ;;  %v507_v12 = vld [vmem:[%s2761_s2 + $0x30] sm:$0xff]  ;;  %v422_v13 = vld [vmem:[%s2097_s18 + $0x188] sm:$0xff] }
  0x21   : > { %860 = vmatpush1.bf16.msra.mxu0 %v445_v27  ;;  %v424_v14 = vld [vmem:[%s2097_s18 + $0x198] sm:$0xff]  ;;  %v463_v16 = vpack.c.bf16 %v427_v11, %v425_v9  ;;  %v421_v17 = vld [vmem:[%s2097_s18 + $0x180] sm:$0xff]  ;;  %v423_v18 = vld [vmem:[%s2097_s18 + $0x190] sm:$0xff] }
  0x22   : > { %861 = vmatprep.subr.bf16.mxu0 %v444_v28  ;;  %v508_v15 = vld [vmem:[%s2761_s2 + $0x38] sm:$0xff]  ;;  %v462_v19 = vpack.c.bf16 %v424_v14, %v422_v13  ;;  %v418_v20 = vld [vmem:[%s2097_s18 + $0x168] sm:$0xff]  ;;  %v505_v22 = vld [vmem:[%s2761_s2 + $0x20] sm:$0xff]  ;;  %v461_v26 = vpack.c.bf16 %v423_v18, %v421_v17 }
  0x23   : > { %v420_v21 = vld [vmem:[%s2097_s18 + $0x178] sm:$0xff]  ;;  %v506_v23 = vld [vmem:[%s2761_s2 + $0x28] sm:$0xff]  ;;  %v417_v24 = vld [vmem:[%s2097_s18 + $0x160] sm:$0xff] }
  0x24   : > { %565 = vperm.xlu0 %1911, %v507_v12   ;;  %570 = vperm.xlu1 %1912, %v508_v15   ;;  %v419_v25 = vld [vmem:[%s2097_s18 + $0x170] sm:$0xff]  ;;  %v414_v27 = vld [vmem:[%s2097_s18 + $0x148] sm:$0xff]  ;;  %v416_v28 = vld [vmem:[%s2097_s18 + $0x158] sm:$0xff]  ;;  %v460_v29 = vpack.c.bf16 %v420_v21, %v418_v20 }
  0x25   : > { %862 = vmatpush1.bf16.msra.mxu0 %v443_v33  ;;  %v503_v30 = vld [vmem:[%s2761_s2 + $0x10] sm:$0xff]  ;;  %v504_v31 = vld [vmem:[%s2761_s2 + $0x18] sm:$0xff]  ;;  %v413_v32 = vld [vmem:[%s2097_s18 + $0x140] sm:$0xff]  ;;  %v459_v35 = vpack.c.bf16 %v419_v25, %v417_v24 }
  0x26   : > { %863 = vmatprep.subr.bf16.mxu0 %v442_v34  ;;  %v415_v33 = vld [vmem:[%s2097_s18 + $0x150] sm:$0xff]  ;;  %v501_v34 = vld [vmem:[%s2761_s2] sm:$0xff]  ;;  %v410_v36 = vld [vmem:[%s2097_s18 + $0x128] sm:$0xff] }
  0x27   : > { %v412_v37 = vld [vmem:[%s2097_s18 + $0x138] sm:$0xff]  ;;  %v502_v38 = vld [vmem:[%s2761_s2 + $0x8] sm:$0xff]  ;;  %v411_v41 = vld [vmem:[%s2097_s18 + $0x130] sm:$0xff]  ;;  %v457_v42 = vpack.c.bf16 %v415_v33, %v413_v32 }
  0x28   : > { %555 = vperm.xlu0 %1911, %v505_v22   ;;  %560 = vperm.xlu1 %1912, %v506_v23   ;;  %v406_v43 = vld [vmem:[%s2097_s18 + $0x108] sm:$0xff]  ;;  %v408_v44 = vld [vmem:[%s2097_s18 + $0x118] sm:$0xff]  ;;  %v456_v47 = vpack.c.bf16 %v412_v37, %v410_v36  ;;  %v405_v50 = vld [vmem:[%s2097_s18 + $0x100] sm:$0xff] }
  0x29   : > { %864 = vmatpush1.bf16.msra.mxu0 %v441_v39  ;;  %v458_v39 = vpack.c.bf16 %v416_v28, %v414_v27  ;;  %v454_v49 = vpack.c.bf16 %v408_v44, %v406_v43  ;;  %v407_v51 = vld [vmem:[%s2097_s18 + $0x110] sm:$0xff]  ;;  %v529_v52 = vld [vmem:[%s2761_s2 + $0xe0] sm:$0xff]  ;;  %v530_v53 = vld [vmem:[%s2761_s2 + $0xe8] sm:$0xff] }
  0x2a   : > { %865 = vmatprep.subr.bf16.mxu0 %v440_v40  ;;  %v409_v40 = vld [vmem:[%s2097_s18 + $0x120] sm:$0xff]  ;;  %v453_v54 = vpack.c.bf16 %v407_v51, %v405_v50  ;;  %v528_v56 = vld [vmem:[%s2761_s2 + $0xd8] sm:$0xff]  ;;  %v526_v60 = vld [vmem:[%s2761_s2 + $0xc8] sm:$0xff] }
  0x2b   : > { %v1913_v57 = vld [vmem:[%s2760_s1] ss:$8 sps:$4 sm:$0xff]   ;;  %v523_v61 = vld [vmem:[%s2761_s2 + $0xb0] sm:$0xff]  ;;  %v524_v62 = vld [vmem:[%s2761_s2 + $0xb8] sm:$0xff] }
  0x2c   : > { %545 = vperm.xlu0 %1911, %v503_v30   ;;  %550 = vperm.xlu1 %1912, %v504_v31   ;;  %v525_v59 = vld [vmem:[%s2761_s2 + $0xc0] sm:$0xff]  ;;  %v1918_v63 = vld [vmem:[%s2760_s1 + $0x10] ss:$8 sps:$4 sm:$0xff]   ;;  %v1922_v7 = vld [vmem:[%s2760_s1 + $0x34] ss:$8 sps:$4 sm:$0xff]  }
  0x2d   : > { %866 = vmatpush1.bf16.msra.mxu0 %v439_v46  ;;  %v532_v46 = vld [vmem:[%s2761_s2 + $0xf8] sm:$0xff]  ;;  %v521_v2 = vld [vmem:[%s2761_s2 + $0xa0] sm:$0xff]  ;;  %v519_v4 = vld [vmem:[%s2761_s2 + $0x90] sm:$0xff] }
  0x2e   : > { %867 = vmatprep.subr.bf16.mxu0 %v438_v48  ;;  %v455_v48 = vpack.c.bf16 %v411_v41, %v409_v40  ;;  %v520_v5 = vld [vmem:[%s2761_s2 + $0x98] sm:$0xff]  ;;  %v1921_v6 = vld [vmem:[%s2760_s1 + $0x20] ss:$8 sps:$4 sm:$0xff]   ;;  %v1925_v13 = vld [vmem:[%s2760_s1 + $0x44] ss:$8 sps:$4 sm:$0xff]  }
  0x2f   : > { %v518_v9 = vld [vmem:[%s2761_s2 + $0x88] sm:$0xff]  ;;  %v1173_v11 = vld [vmem:[%s2763_s4 + $0x78] sm:$0xff]  ;;  %v1170_v14 = vld [vmem:[%s2763_s4 + $0x60] sm:$0xff] }
  0x30   : > { %535 = vperm.xlu0 %1911, %v501_v34   ;;  %540 = vperm.xlu1 %1912, %v502_v38   ;;  %v1924_v12 = vld [vmem:[%s2760_s1 + $0x30] ss:$8 sps:$4 sm:$0xff]   ;;  %v1171_v15 = vld [vmem:[%s2763_s4 + $0x68] sm:$0xff]  ;;  %v1166_v20 = vld [vmem:[%s2763_s4 + $0x40] sm:$0xff] }
  0x31   : > { %868 = vmatpush1.bf16.msra.mxu0 %v437_v55  ;;  %v527_v55 = vld [vmem:[%s2761_s2 + $0xd0] sm:$0xff]  ;;  %v1169_v17 = vld [vmem:[%s2763_s4 + $0x58] sm:$0xff]  ;;  %v1927_v18 = vld [vmem:[%s2760_s1 + $0x40] ss:$8 sps:$4 sm:$0xff]  }
  0x32   : > { %869 = vmatprep.subr.bf16.mxu0 %v468_v58  ;;  %v1916_v58 = vld [vmem:[%s2760_s1 + $0x14] ss:$8 sps:$4 sm:$0xff]   ;;  %v1167_v21 = vld [vmem:[%s2763_s4 + $0x48] sm:$0xff]  ;;  %v1930_v24 = vld [vmem:[%s2760_s1 + $0x50] ss:$8 sps:$4 sm:$0xff]  }
  0x33   : > { %v1164_v22 = vld [vmem:[%s2763_s4 + $0x30] sm:$0xff]  ;;  %v1165_v23 = vld [vmem:[%s2763_s4 + $0x38] sm:$0xff]  ;;  %v1931_v25 = vld [vmem:[%s2760_s1 + $0x64] ss:$8 sps:$4 sm:$0xff]  }
  0x34   : > { %685 = vperm.xlu0 %1911, %v531_v45   ;;  %690 = vperm.xlu1 %1912, %v532_v46   ;;  %v1163_v27 = vld [vmem:[%s2763_s4 + $0x28] sm:$0xff]  ;;  %v1160_v28 = vld [vmem:[%s2763_s4 + $0x10] sm:$0xff]  ;;  %v1158_v32 = vld [vmem:[%s2763_s4] sm:$0xff] }
  0x35   : > { %870 = vmatpush2.bf16.msra.mxu0 %v467_v0  ;;  %v1919_v0 = vld [vmem:[%s2760_s1 + $0x24] ss:$8 sps:$4 sm:$0xff]   ;;  %v1933_v30 = vld [vmem:[%s2760_s1 + $0x60] ss:$8 sps:$4 sm:$0xff]   ;;  %v1934_v31 = vld [vmem:[%s2760_s1 + $0x74] ss:$8 sps:$4 sm:$0xff]  }
  0x36   : > { %871 = vmatprep.subr.bf16.mxu0 %v466_v3  ;;  %v522_v3 = vld [vmem:[%s2761_s2 + $0xa8] sm:$0xff]  ;;  %v1509_v34 = vld [vmem:[%s2765_s6 + $0x30] sm:$0xff]  ;;  %v1507_v38 = vld [vmem:[%s2765_s6 + $0x20] sm:$0xff] }
  0x37   : > { %v1159_v33 = vld [vmem:[%s2763_s4 + $0x8] sm:$0xff]  ;;  %v1936_v36 = vld [vmem:[%s2760_s1 + $0x70] ss:$8 sps:$4 sm:$0xff]   ;;  %v1940_v43 = vld [vmem:[%s2760_s1 + $0x94] ss:$8 sps:$4 sm:$0xff]  }
  0x38   : > { %675 = vperm.xlu0 %1911, %v529_v52   ;;  %680 = vperm.xlu1 %1912, %v530_v53   ;;  %v1937_v37 = vld [vmem:[%s2760_s1 + $0x84] ss:$8 sps:$4 sm:$0xff]   ;;  %v1505_v40 = vld [vmem:[%s2765_s6 + $0x10] sm:$0xff]  ;;  %v1506_v41 = vld [vmem:[%s2765_s6 + $0x18] sm:$0xff] }
  0x39   : > { %872 = vmatpush2.bf16.msra.mxu0 %v465_v8  ;;  %v517_v8 = vld [vmem:[%s2761_s2 + $0x80] sm:$0xff]  ;;  %v1504_v45 = vld [vmem:[%s2765_s6 + $0x8] sm:$0xff]  ;;  %v1946_v50 = vld [vmem:[%s2760_s1 + $0xb4] ss:$8 sps:$4 sm:$0xff]  }
  0x3a   : > { %873 = vmatprep.subr.bf16.mxu0 %v464_v10  ;;  %v1172_v10 = vld [vmem:[%s2763_s4 + $0x70] sm:$0xff]  ;;  %v1503_v44 = vld [vmem:[%s2765_s6] sm:$0xff] }
  0x3b   : > { %v1718_v46 = vld [vmem:[%s2767_s8] sm:$0x7]  ;;  %v1948_v51 = vld [vmem:[%s2760_s1 + $0xb0] ss:$8 sps:$4 sm:$0xff]   ;;  %v1949_v52 = vld [vmem:[%s2760_s1 + $0xc4] ss:$8 sps:$4 sm:$0xff]  }
  0x3c   : > { %665 = vperm.xlu0 %1911, %v527_v55   ;;  %670 = vperm.xlu1 %1912, %v528_v56   ;;  %v1951_v53 = vld [vmem:[%s2760_s1 + $0xc0] ss:$8 sps:$4 sm:$0xff]   ;;  %v1954_v55 = vld [vmem:[%s2760_s1 + $0xd0] ss:$8 sps:$4 sm:$0xff]   ;;  %v1955_v56 = vld [vmem:[%s2760_s1 + $0xe4] ss:$8 sps:$4 sm:$0xff]  }
  0x3d   : > { %874 = vmatpush2.bf16.msra.mxu0 %v463_v16  ;;  %v1168_v16 = vld [vmem:[%s2763_s4 + $0x50] sm:$0xff] }
  0x3e   : > { %875 = vmatprep.subr.bf16.mxu0 %v462_v19  ;;  %v1928_v19 = vld [vmem:[%s2760_s1 + $0x54] ss:$8 sps:$4 sm:$0xff]  }
  0x40   : > { %655 = vperm.xlu0 %1911, %v525_v59   ;;  %660 = vperm.xlu1 %1912, %v526_v60   ;;  %v1960_v59 = vld [vmem:[%s2760_s1 + $0xf0] ss:$8 sps:$4 sm:$0xff]  }
  0x41   : > { %876 = vmatpush2.bf16.msra.mxu0 %v461_v26  ;;  %v1162_v26 = vld [vmem:[%s2763_s4 + $0x20] sm:$0xff] }
  0x42   : > { %877 = vmatprep.subr.bf16.mxu0 %v460_v29  ;;  %v1161_v29 = vld [vmem:[%s2763_s4 + $0x18] sm:$0xff] }
  0x44   : > { %645 = vperm.xlu0 %1911, %v523_v61   ;;  %650 = vperm.xlu1 %1912, %v524_v62  }
  0x45   : > { %878 = vmatpush2.bf16.msra.mxu0 %v459_v35  ;;  %v1510_v35 = vld [vmem:[%s2765_s6 + $0x38] sm:$0xff] }
  0x46   : > { %879 = vmatprep.subr.bf16.mxu0 %v458_v39  ;;  %v1508_v39 = vld [vmem:[%s2765_s6 + $0x28] sm:$0xff] }
  0x48   : > { %635 = vperm.xlu0 %1911, %v521_v2   ;;  %640 = vperm.xlu1 %1912, %v522_v3  }
  0x49   : > { %880 = vmatpush2.bf16.msra.mxu0 %v457_v42  ;;  %v1939_v42 = vld [vmem:[%s2760_s1 + $0x80] ss:$8 sps:$4 sm:$0xff]  }
  0x4a   : > { %881 = vmatprep.subr.bf16.mxu0 %v456_v47  ;;  %v1942_v47 = vld [vmem:[%s2760_s1 + $0x90] ss:$8 sps:$4 sm:$0xff]  }
  0x4c   : > { %625 = vperm.xlu0 %1911, %v519_v4   ;;  %630 = vperm.xlu1 %1912, %v520_v5  }
  0x4d   : > { %882 = vmatpush2.bf16.msra.mxu0 %v455_v48  ;;  %v1943_v48 = vld [vmem:[%s2760_s1 + $0xa4] ss:$8 sps:$4 sm:$0xff]  }
  0x4e   : > { %883 = vmatprep.subr.bf16.mxu0 %v454_v49  ;;  %v1945_v49 = vld [vmem:[%s2760_s1 + $0xa0] ss:$8 sps:$4 sm:$0xff]  }
  0x50   : > { %615 = vperm.xlu0 %1911, %v517_v8   ;;  %620 = vperm.xlu1 %1912, %v518_v9  }
  0x51   : > { %884 = vmatpush2.bf16.msra.mxu0 %v453_v54  ;;  %v1952_v54 = vld [vmem:[%s2760_s1 + $0xd4] ss:$8 sps:$4 sm:$0xff]  }
  0x54   : > { %886 = vmatmul.mubr.bf16.vlgmr.msra.gmra.mxu0 %v1913_v57  ;;  %1246 = vperm.xlu0 %1911, %v1172_v10   ;;  %v1957_v57 = vld [vmem:[%s2760_s1 + $0xe0] ss:$8 sps:$4 sm:$0xff]  }
  0x55   : > { %895 = vmatprep.mubr.bf16.mxu0 %v1916_v58  ;;  %1251 = vperm.xlu1 %1912, %v1173_v11   ;;  %v1958_v58 = vld [vmem:[%s2760_s1 + $0xf4] ss:$8 sps:$4 sm:$0xff]  }
  0x58   : > { %1236 = vperm.xlu0 %1911, %v1170_v14  }
  0x59   : > { %1241 = vperm.xlu1 %1912, %v1171_v15  }
  0x5c   : > { %896 = vmatmul.mubr.bf16.gmra.mxu0 %v1918_v63  ;;  %1226 = vperm.xlu0 %1911, %v1168_v16  }
  0x5d   : > { %905 = vmatprep.mubr.bf16.mxu0 %v1919_v0  ;;  %1231 = vperm.xlu1 %1912, %v1169_v17  }
  0x60   : > { %1216 = vperm.xlu0 %1911, %v1166_v20  }
  0x61   : > { %1221 = vperm.xlu1 %1912, %v1167_v21  }
  0x64   : > { %906 = vmatmul.mubr.bf16.gmra.mxu0 %v1921_v6  ;;  %1206 = vperm.xlu0 %1911, %v1164_v22  }
  0x65   : > { %915 = vmatprep.mubr.bf16.mxu0 %v1922_v7  ;;  %1211 = vperm.xlu1 %1912, %v1165_v23  }
  0x68   : > { %1196 = vperm.xlu0 %1911, %v1162_v26  }
  0x69   : > { %1201 = vperm.xlu1 %1912, %v1163_v27  }
  0x6c   : > { %916 = vmatmul.mubr.bf16.gmra.mxu0 %v1924_v12  ;;  %1186 = vperm.xlu0 %1911, %v1160_v28  }
  0x6d   : > { %925 = vmatprep.mubr.bf16.mxu0 %v1925_v13  ;;  %1191 = vperm.xlu1 %1912, %v1161_v29  }
  0x70   : > { %1176 = vperm.xlu0 %1911, %v1158_v32  }
  0x71   : > { %1181 = vperm.xlu1 %1912, %v1159_v33  }
  0x74   : > { %926 = vmatmul.mubr.bf16.gmra.mxu0 %v1927_v18  ;;  %1543 = vperm.xlu0 %1911, %v1509_v34  }
  0x75   : > { %935 = vmatprep.mubr.bf16.mxu0 %v1928_v19  ;;  %1548 = vperm.xlu1 %1912, %v1510_v35  }
  0x78   : > { %1533 = vperm.xlu0 %1911, %v1507_v38  }
  0x79   : > { %1538 = vperm.xlu1 %1912, %v1508_v39  }
  0x7c   : > { %936 = vmatmul.mubr.bf16.gmra.mxu0 %v1930_v24  ;;  %1523 = vperm.xlu0 %1911, %v1505_v40  }
  0x7d   : > { %945 = vmatprep.mubr.bf16.mxu0 %v1931_v25  ;;  %1528 = vperm.xlu1 %1912, %v1506_v41  }
  0x80   : > { %1513 = vperm.xlu0 %1911, %v1503_v44  }
  0x81   : > { %1518 = vperm.xlu1 %1912, %v1504_v45  }
  0x84   : > { %946 = vmatmul.mubr.bf16.gmra.mxu0 %v1933_v30  ;;  %1721 = vperm.xlu0 %1911, %v1718_v46  }
  0x85   : > { %955 = vmatprep.mubr.bf16.mxu0 %v1934_v31 }
  0x89   : > { %v2427_v60 = vpop.permute.xlu0 %605 }
  0x8a   : > { %v2429_v61 = vpop.permute.xlu1 %595 }
  0x8c   : > { %956 = vmatmul.mubr.bf16.gmra.mxu0 %v1936_v36 }
  0x8d   : > { %965 = vmatprep.mubr.bf16.mxu0 %v1937_v37  ;;  %v2431_v62 = vpop.permute.xlu0 %610 }
  0x8e   : > { %v2433_v63 = vpop.permute.xlu1 %600 }
  0x91   : > { %v2435_v0 = vpop.permute.xlu0 %585 }
  0x92   : > { %v2437_v2 = vpop.permute.xlu1 %590 }
  0x94   : > { %966 = vmatmul.mubr.bf16.gmra.mxu0 %v1939_v42 }
  0x95   : > { %975 = vmatprep.mubr.bf16.mxu0 %v1940_v43 }
  0x9b   : > { %v2439_v3 = vpop.permute.xlu0 %575  ;;  %v2441_v4 = vpop.permute.xlu1 %580 }
  0x9c   : > { %976 = vmatmul.mubr.bf16.gmra.mxu0 %v1942_v47 }
  0x9d   : > { %985 = vmatprep.mubr.bf16.mxu0 %v1943_v48 }
  0x9f   : > { %v2443_v5 = vpop.permute.xlu0 %565  ;;  %v2445_v6 = vpop.permute.xlu1 %570 }
  0xa3   : > { %v2447_v7 = vpop.permute.xlu0 %555  ;;  %v2449_v8 = vpop.permute.xlu1 %560 }
  0xa4   : > { %986 = vmatmul.mubr.bf16.gmra.mxu0 %v1945_v49 }
  0xa5   : > { %995 = vmatprep.mubr.bf16.mxu0 %v1946_v50 }
  0xa7   : > { %v546_v9 = vpop.permute.xlu0 %545  ;;  %v551_v10 = vpop.permute.xlu1 %550 }
  0xab   : > { %v536_v11 = vpop.permute.xlu0 %535  ;;  %v541_v14 = vpop.permute.xlu1 %540 }
  0xac   : > { %996 = vmatmul.mubr.bf16.gmra.mxu0 %v1948_v51 }
  0xad   : > { %1005 = vmatprep.mubr.bf16.mxu0 %v1949_v52 }
  0xaf   : > { %v2467_v45 = vpop.permute.xlu0 %685  ;;  %v2471_v47 = vpop.permute.xlu1 %690 }
  0xb3   : > { %v2477_v50 = vpop.permute.xlu0 %675  ;;  %v2479_v52 = vpop.permute.xlu1 %680 }
  0xb4   : > { %1006 = vmatmul.mubr.bf16.gmra.mxu0 %v1951_v53 }
  0xb5   : > { %1015 = vmatprep.mubr.bf16.mxu0 %v1952_v54 }
  0xbc   : > { %1016 = vmatmul.mubr.bf16.gmra.mxu0 %v1954_v55  ;;  %v1963_v55 = vld [vmem:[%s2762_s3 + $0x4] ss:$8 sps:$4 sm:$0xff]  }
  0xbd   : > { %1025 = vmatprep.mubr.bf16.mxu0 %v1955_v56  ;;  %v2486_v56 = vpop.permute.xlu0 %665  ;;  %1366 = vmatprep.mubr.bf16.mxu1 %v1963_v55 }
  0xc4   : > { %1026 = vmatmul.mubr.bf16.gmra.mxu0 %v1957_v57 }
  0xc5   : > { %1035 = vmatprep.mubr.bf16.mxu0 %v1958_v58  ;;  %v2490_v58 = vpop.permute.xlu1 %670 }
  0xcc   : > { %1036 = vmatmul.mubr.bf16.gmra.mxu0 %v1960_v59 }
 0x114   : > { %v887_v12 = vpop.f32.mrf.mxu0 }
 0x115   : > { %v888_v15 = vadd.f32 %v887_v12, %v536_v11  ;;  %v2494_v12 = vpop.permute.xlu1 %660 }
 0x116   : > { %v889_v13 = vpop.f32.mrf.mxu0  ;;  %2778 = vst [vmem:[#allocation3_spill] sm:$0xff] %v2494_v12 }
 0x117   : > { %v890_v17 = vadd.f32 %v889_v13, %v536_v11  ;;  %v1046_v20 = vmax.f32 %v888_v15, 0.0 }
 0x118   : > { %v891_v16 = vpop.f32.mrf.mxu0 }
 0x119   : > { %v892_v18 = vadd.f32 %v891_v16, %v541_v14  ;;  %v1047_v24 = vmax.f32 %v890_v17, 0.0  ;;  %v2498_v17 = vpop.permute.xlu1 %650 }
 0x11a   : > { %v893_v19 = vpop.f32.mrf.mxu0  ;;  %2780 = vst [vmem:[#allocation5_spill] sm:$0xff] %v2498_v17 }
 0x11b   : > { %v1048_v21 = vmax.f32 %v892_v18, 0.0  ;;  %v894_v22 = vadd.f32 %v893_v19, %v541_v14 }
 0x11c   : > { %v897_v23 = vpop.f32.mrf.mxu0 }
 0x11d   : > { %v2451_v25 = vpack.c.bf16 %v1048_v21, %v1046_v20  ;;  %v1049_v26 = vmax.f32 %v894_v22, 0.0  ;;  %v898_v29 = vadd.f32 %v897_v23, %v546_v9  ;;  %v2502_v22 = vpop.permute.xlu1 %640 }
 0x11e   : > { %v899_v27 = vpop.f32.mrf.mxu0  ;;  %2782 = vst [vmem:[#allocation7_spill] sm:$0xff] %v2502_v22 }
 0x11f   : > { %v2453_v28 = vpack.c.bf16 %v1049_v26, %v1047_v24  ;;  %v900_v31 = vadd.f32 %v899_v27, %v546_v9  ;;  %v1050_v34 = vmax.f32 %v898_v29, 0.0 }
 0x120   : > { %v901_v30 = vpop.f32.mrf.mxu0 }
 0x121   : > { %v902_v32 = vadd.f32 %v901_v30, %v551_v10  ;;  %v1051_v38 = vmax.f32 %v900_v31, 0.0 }
 0x122   : > { %v903_v33 = vpop.f32.mrf.mxu0 }
 0x123   : > { %v1052_v35 = vmax.f32 %v902_v32, 0.0  ;;  %v904_v36 = vadd.f32 %v903_v33, %v551_v10  ;;  %v2492_v10 = vpop.permute.xlu0 %655  ;;  %v2509_v32 = vpop.permute.xlu1 %630 }
 0x124   : > { %v2455_v37 = vpop.f32.mrf.mxu0  ;;  %2777 = vst [vmem:[#allocation2_spill] sm:$0xff] %v2492_v10 }
 0x125   : > { %v2457_v39 = vpack.c.bf16 %v1052_v35, %v1050_v34  ;;  %v1053_v40 = vmax.f32 %v904_v36, 0.0 }
 0x126   : > { %v2459_v41 = vpop.f32.mrf.mxu0 }
 0x127   : > { %v2461_v42 = vpack.c.bf16 %v1053_v40, %v1051_v38  ;;  %v2496_v15 = vpop.permute.xlu0 %645 }
 0x128   : > { %v2463_v43 = vpop.f32.mrf.mxu0  ;;  %2779 = vst [vmem:[#allocation4_spill] sm:$0xff] %v2496_v15 }
 0x12a   : > { %v2465_v44 = vpop.f32.mrf.mxu0 }
 0x12b   : > { %v2500_v20 = vpop.permute.xlu0 %635 }
 0x12c   : > { %v2469_v46 = vpop.f32.mrf.mxu0  ;;  %2781 = vst [vmem:[#allocation6_spill] sm:$0xff] %v2500_v20 }
 0x12e   : > { %v2473_v48 = vpop.f32.mrf.mxu0 }
 0x12f   : > { %v2504_v26 = vpop.permute.xlu0 %625 }
 0x130   : > { %v2475_v49 = vpop.f32.mrf.mxu0 }
 0x132   : > { %v923_v51 = vpop.f32.mrf.mxu0 }
 0x133   : > { %v616_v22 = vpop.permute.xlu0 %615 }
 0x134   : > { %v2481_v53 = vpop.f32.mrf.mxu0 }
 0x136   : > { %v929_v54 = vpop.f32.mrf.mxu0 }
 0x138   : > { %v2488_v57 = vpop.f32.mrf.mxu0 }
 0x13a   : > { %v933_v59 = vpop.f32.mrf.mxu0 }
 0x13c   : > { %v937_v9 = vpop.f32.mrf.mxu0 }
 0x13e   : > { %v939_v11 = vpop.f32.mrf.mxu0 }
 0x140   : > { %v941_v13 = vpop.f32.mrf.mxu0 }
 0x142   : > { %v943_v14 = vpop.f32.mrf.mxu0 }
 0x143   : > { %v944_v1 = vadd.f32 %v943_v14, %v2437_v2 }
 0x144   : > { %v947_v16 = vpop.f32.mrf.mxu0 }
 0x146   : > { %v949_v18 = vpop.f32.mrf.mxu0 }
 0x147   : > { %v950_v35 = vadd.f32 %v949_v18, %v2429_v61 }
 0x148   : > { %v951_v19 = vpop.f32.mrf.mxu0 }
 0x149   : > { %v952_v38 = vadd.f32 %v951_v19, %v2433_v63  ;;  %v621_v19 = vpop.permute.xlu1 %620 }
 0x14a   : > { %v953_v21 = vpop.f32.mrf.mxu0 }
 0x14b   : > { %v954_v29 = vadd.f32 %v953_v21, %v2433_v63  ;;  %v942_v63 = vadd.f32 %v941_v13, %v2437_v2 }
 0x14c   : > { %v957_v23 = vpop.f32.mrf.mxu0 }
 0x14d   : > { %v958_v33 = vadd.f32 %v957_v23, %v2427_v60  ;;  %v1073_v21 = vmax.f32 %v954_v29, 0.0  ;;  %v1071_v23 = vmax.f32 %v950_v35, 0.0 }
 0x14e   : > { %v959_v24 = vpop.f32.mrf.mxu0 }
 0x14f   : > { %v960_v30 = vadd.f32 %v959_v24, %v2427_v60  ;;  %v1074_v15 = vmax.f32 %v958_v33, 0.0  ;;  %v940_v60 = vadd.f32 %v939_v11, %v2435_v0  ;;  %v930_v11 = vadd.f32 %v929_v54, %v2439_v3 }
 0x150   : > { %v961_v27 = vpop.f32.mrf.mxu0 }
 0x151   : > { %v962_v31 = vadd.f32 %v961_v27, %v2431_v62  ;;  %v1075_v20 = vmax.f32 %v960_v30, 0.0  ;;  %v948_v27 = vadd.f32 %v947_v16, %v2429_v61  ;;  %v1069_v30 = vmax.f32 %v944_v1, 0.0 }
 0x152   : > { %v963_v34 = vpop.f32.mrf.mxu0  ;;  %v924_v61 = vadd.f32 %v923_v51, %v2445_v6  ;;  %v938_v16 = vadd.f32 %v937_v9, %v2435_v0  ;;  %v932_v1 = vadd.f32 %v2488_v57, %v2441_v4  ;;  %v928_v9 = vadd.f32 %v2481_v53, %v2439_v3 }
 0x153   : > { %v964_v36 = vadd.f32 %v963_v34, %v2431_v62  ;;  %v1076_v40 = vmax.f32 %v962_v31, 0.0  ;;  %v934_v62 = vadd.f32 %v933_v59, %v2441_v4  ;;  %v1072_v31 = vmax.f32 %v952_v38, 0.0 }
 0x154   : > { %v967_v55 = vpop.f32.mrf.mxu0  ;;  %v1123_v34 = vpack.c.bf16 %v1073_v21, %v1071_v23  ;;  %v1067_v59 = vmax.f32 %v940_v60, 0.0  ;;  %v1063_v21 = vmax.f32 %v930_v11, 0.0  ;;  %v1064_v60 = vmax.f32 %v932_v1, 0.0 }
 0x155   : > { %v1077_v24 = vmax.f32 %v964_v36, 0.0  ;;  %v968_v18 = vadd.f32 %v967_v55, %v616_v22  ;;  %v1124_v29 = vpack.c.bf16 %v1076_v40, %v1074_v15  ;;  %v1065_v15 = vmax.f32 %v934_v62, 0.0 }
 0x156   : > { %v969_v17 = vpop.f32.mrf.mxu0  ;;  %v1121_v51 = vpack.c.bf16 %v1069_v30, %v1067_v59  ;;  %v1066_v40 = vmax.f32 %v938_v16, 0.0  ;;  %v1061_v23 = vmax.f32 %v924_v61, 0.0  ;;  %v908_v16 = vadd.f32 %v2455_v37, %v2447_v7 }
 0x157   : > { %v1125_v10 = vpack.c.bf16 %v1077_v24, %v1075_v20  ;;  %v970_v36 = vadd.f32 %v969_v17, %v616_v22  ;;  %v1070_v20 = vmax.f32 %v948_v27, 0.0  ;;  %v1078_v2 = vmax.f32 %v968_v18, 0.0 }
 0x158   : > { %v971_v14 = vpop.f32.mrf.mxu0  ;;  %v1068_v17 = vmax.f32 %v942_v63, 0.0  ;;  %v914_v24 = vadd.f32 %v2465_v44, %v2449_v8  ;;  %v922_v27 = vadd.f32 %v2475_v49, %v2445_v6  ;;  %v1119_v18 = vpack.c.bf16 %v1065_v15, %v1063_v21 }
 0x159   : > { %v972_v12 = vadd.f32 %v971_v14, %v621_v19  ;;  %1334 = vmatprep.subr.bf16.mxu1 %v1125_v10  ;;  %v1122_v10 = vpack.c.bf16 %v1072_v31, %v1070_v20  ;;  %v1079_v38 = vmax.f32 %v970_v36, 0.0  ;;  %v910_v63 = vadd.f32 %v2459_v41, %v2447_v7 }
 0x15a   : > { %v973_v33 = vpop.f32.mrf.mxu0  ;;  %1335 = vmatpush1.bf16.msra.mxu1 %v1124_v29  ;;  %v1120_v3 = vpack.c.bf16 %v1068_v17, %v1066_v40  ;;  %v1062_v31 = vmax.f32 %v928_v9, 0.0  ;;  %v1057_v30 = vmax.f32 %v914_v24, 0.0 }
 0x15b   : > { %v1080_v13 = vmax.f32 %v972_v12, 0.0  ;;  %v974_v35 = vadd.f32 %v973_v33, %v621_v19  ;;  %1336 = vmatprep.subr.bf16.mxu1 %v1123_v34  ;;  %v920_v12 = vadd.f32 %v2473_v48, %v2443_v5  ;;  %v918_v19 = vadd.f32 %v2469_v46, %v2443_v5 }
 0x15c   : > { %v977_v22 = vpop.f32.mrf.mxu0  ;;  %v1060_v34 = vmax.f32 %v922_v27, 0.0  ;;  %v1118_v36 = vpack.c.bf16 %v1064_v60, %v1062_v31 }
 0x15d   : > { %v2525_v54 = vpack.c.bf16 %v1080_v13, %v1078_v2  ;;  %v1081_v0 = vmax.f32 %v974_v35, 0.0  ;;  %v978_v57 = vadd.f32 %v977_v22, %v2504_v26  ;;  %v1059_v14 = vmax.f32 %v920_v12, 0.0 }
 0x15e   : > { %v979_v55 = vpop.f32.mrf.mxu0  ;;  %1337 = vmatpush1.bf16.msra.mxu1 %v1122_v10  ;;  %v1058_v20 = vmax.f32 %v918_v19, 0.0  ;;  %v1054_v35 = vmax.f32 %v908_v16, 0.0 }
 0x15f   : > { %v2531_v4 = vpack.c.bf16 %v1081_v0, %v1079_v38  ;;  %1338 = vmatprep.subr.bf16.mxu1 %v1121_v51  ;;  %v980_v62 = vadd.f32 %v979_v55, %v2504_v26  ;;  %v1082_v6 = vmax.f32 %v978_v57, 0.0  ;;  %v912_v26 = vadd.f32 %v2463_v43, %v2449_v8 }
 0x160   : > { %v981_v53 = vpop.f32.mrf.mxu0  ;;  %v1117_v41 = vpack.c.bf16 %v1061_v23, %v1059_v14  ;;  %v1116_v43 = vpack.c.bf16 %v1060_v34, %v1058_v20  ;;  %v2784_v20 = vld [vmem:[#allocation2_spill] sm:$0xff] }
 0x161   : > { %v982_v48 = vadd.f32 %v981_v53, %v2509_v32  ;;  %v1083_v11 = vmax.f32 %v980_v62, 0.0  ;;  %v1056_v8 = vmax.f32 %v912_v26, 0.0 }
 0x162   : > { %v983_v44 = vpop.f32.mrf.mxu0  ;;  %1339 = vmatpush1.bf16.msra.mxu1 %v1120_v3 }
 0x163   : > { %v1084_v49 = vmax.f32 %v982_v48, 0.0  ;;  %v984_v29 = vadd.f32 %v983_v44, %v2509_v32  ;;  %1340 = vmatprep.subr.bf16.mxu1 %v1119_v18  ;;  %v1055_v32 = vmax.f32 %v910_v63, 0.0  ;;  %v1114_v15 = vpack.c.bf16 %v1056_v8, %v1054_v35 }
 0x164   : > { %v2547_v61 = vpop.f32.mrf.mxu0 }
 0x165   : > { %v2549_v5 = vpack.c.bf16 %v1084_v49, %v1082_v6  ;;  %v1085_v46 = vmax.f32 %v984_v29, 0.0  ;;  %v1115_v13 = vpack.c.bf16 %v1057_v30, %v1055_v32 }
 0x166   : > { %v2553_v33 = vpop.f32.mrf.mxu0  ;;  %1341 = vmatpush1.bf16.msra.mxu1 %v1118_v36 }
 0x167   : > { %v2555_v59 = vpack.c.bf16 %v1085_v46, %v1083_v11  ;;  %1342 = vmatprep.subr.bf16.mxu1 %v1117_v41 }
 0x168   : > { %v2557_v2 = vpop.f32.mrf.mxu0 }
 0x16a   : > { %v2559_v1 = vpop.f32.mrf.mxu0  ;;  %1343 = vmatpush1.bf16.msra.mxu1 %v1116_v43 }
 0x16b   : > { %1344 = vmatprep.subr.bf16.mxu1 %v1115_v13 }
 0x16c   : > { %v2561_v7 = vpop.f32.mrf.mxu0 }
 0x16e   : > { %v2563_v37 = vpop.f32.mrf.mxu0  ;;  %1345 = vmatpush1.bf16.msra.mxu1 %v1114_v15 }
 0x16f   : > { %1346 = vmatprep.subr.bf16.mxu1 %v2461_v42 }
 0x170   : > { %v2566_v17 = vpop.f32.mrf.mxu0 }
 0x172   : > { %v1003_v10 = vpop.f32.mrf.mxu0  ;;  %1347 = vmatpush1.bf16.msra.mxu1 %v2457_v39 }
 0x173   : > { %1348 = vmatprep.subr.bf16.mxu1 %v2453_v28 }
 0x174   : > { %v1007_v22 = vpop.f32.mrf.mxu0 }
 0x176   : > { %v1009_v51 = vpop.f32.mrf.mxu0  ;;  %1349 = vmatpush1.bf16.msra.mxu1 %v2451_v25 }
 0x178   : > { %v1011_v38 = vpop.f32.mrf.mxu0 }
 0x17a   : > { %v1013_v0 = vpop.f32.mrf.mxu0 }
 0x17c   : > { %v1017_v9 = vpop.f32.mrf.mxu0 }
 0x17d   : > { %v1018_v46 = vadd.f32 %v1017_v9, %v2486_v56 }
 0x17e   : > { %v1019_v40 = vpop.f32.mrf.mxu0 }
 0x17f   : > { %v1020_v29 = vadd.f32 %v1019_v40, %v2486_v56 }
 0x180   : > { %v1021_v55 = vpop.f32.mrf.mxu0 }
 0x181   : > { %v1022_v30 = vadd.f32 %v1021_v55, %v2490_v58  ;;  %v1099_v32 = vmax.f32 %v1020_v29, 0.0  ;;  %v1098_v55 = vmax.f32 %v1018_v46, 0.0  ;;  %v1981_v29 = vld [vmem:[%s2762_s3 + $0x60] ss:$8 sps:$4 sm:$0xff]  }
 0x182   : > { %v1023_v12 = vpop.f32.mrf.mxu0 }
 0x183   : > { %v1024_v19 = vadd.f32 %v1023_v12, %v2490_v58  ;;  %v1100_v43 = vmax.f32 %v1022_v30, 0.0  ;;  %v2785_v58 = vld [vmem:[#allocation5_spill] sm:$0xff]  ;;  %v2786_v12 = vld [vmem:[#allocation4_spill] sm:$0xff]  ;;  %v2789_v30 = vmov 0  }
 0x184   : > { %v1027_v21 = vpop.f32.mrf.mxu0  ;;  %v1004_v35 = vadd.f32 %v1003_v10, %v2785_v58  ;;  %v1000_v56 = vadd.f32 %v2563_v37, %v2786_v12 }
 0x185   : > { %v1028_v6 = vadd.f32 %v1027_v21, %v2477_v50 }
 0x186   : > { %v1029_v57 = vpop.f32.mrf.mxu0  ;;  %v1093_v10 = vmax.f32 %v1004_v35, 0.0 }
 0x187   : > { %v1030_v18 = vadd.f32 %v1029_v57, %v2477_v50  ;;  %v1102_v16 = vmax.f32 %v1028_v6, 0.0  ;;  %v1010_v50 = vadd.f32 %v1009_v51, %v2784_v20  ;;  %v1002_v51 = vadd.f32 %v2566_v17, %v2785_v58  ;;  %v2787_v57 = vld [vmem:[#allocation7_spill] sm:$0xff]  ;;  %v1978_v6 = vld [vmem:[%s2762_s3 + $0x50] ss:$8 sps:$4 sm:$0xff]  }
 0x188   : > { %v1031_v42 = vpop.f32.mrf.mxu0  ;;  %v992_v17 = vadd.f32 %v2557_v2, %v2787_v57  ;;  %v1964_v2 = vld [vmem:[%s2762_s3 + $0x14] ss:$8 sps:$4 sm:$0xff]  }
 0x189   : > { %v1032_v48 = vadd.f32 %v1031_v42, %v2479_v52  ;;  %v1103_v26 = vmax.f32 %v1030_v18, 0.0  ;;  %v1095_v9 = vmax.f32 %v1010_v50, 0.0  ;;  %v994_v42 = vadd.f32 %v2559_v1, %v2787_v57 }
 0x18a   : > { %v1033_v24 = vpop.f32.mrf.mxu0  ;;  %v1088_v18 = vmax.f32 %v992_v17, 0.0 }
 0x18b   : > { %v1034_v39 = vadd.f32 %v1033_v24, %v2479_v52  ;;  %v1104_v34 = vmax.f32 %v1032_v48, 0.0  ;;  %v1101_v52 = vmax.f32 %v1024_v19, 0.0  ;;  %v1972_v19 = vld [vmem:[%s2762_s3 + $0x30] ss:$8 sps:$4 sm:$0xff]  }
 0x18c   : > { %v1037_v27 = vpop.f32.mrf.mxu0 }
 0x18d   : > { %v1038_v25 = vadd.f32 %v1037_v27, %v2467_v45  ;;  %v1105_v31 = vmax.f32 %v1034_v39, 0.0  ;;  %v1138_v13 = vpack.c.bf16 %v1104_v34, %v1102_v16  ;;  %v1137_v40 = vpack.c.bf16 %v1101_v52, %v1099_v32  ;;  %v2652_v34 = vpop.permute.xlu0 %1246 }
 0x18e   : > { %v1039_v60 = vpop.f32.mrf.mxu0  ;;  %v1092_v39 = vmax.f32 %v1002_v51, 0.0 }
 0x18f   : > { %v1040_v28 = vadd.f32 %v1039_v60, %v2467_v45  ;;  %v1106_v49 = vmax.f32 %v1038_v25, 0.0  ;;  %v1139_v11 = vpack.c.bf16 %v1105_v31, %v1103_v26  ;;  %v2788_v60 = vld [vmem:[#allocation6_spill] sm:$0xff]  ;;  %v1982_v26 = vld [vmem:[%s2762_s3 + $0x74] ss:$8 sps:$4 sm:$0xff]  }
 0x190   : > { %v1041_v3 = vpop.f32.mrf.mxu0  ;;  %v990_v37 = vadd.f32 %v2553_v33, %v2788_v60  ;;  %v988_v1 = vadd.f32 %v2547_v61, %v2788_v60  ;;  %v1961_v61 = vld [vmem:[%s2762_s3] ss:$8 sps:$4 sm:$0xff]   ;;  %v1973_v31 = vld [vmem:[%s2762_s3 + $0x44] ss:$8 sps:$4 sm:$0xff]  }
 0x191   : > { %v1042_v53 = vadd.f32 %v1041_v3, %v2471_v47  ;;  %v1107_v44 = vmax.f32 %v1040_v28, 0.0  ;;  %v1091_v3 = vmax.f32 %v1000_v56, 0.0 }
 0x192   : > { %v1043_v23 = vpop.f32.mrf.mxu0  ;;  %v1086_v33 = vmax.f32 %v988_v1, 0.0 }
 0x193   : > { %v1044_v62 = vadd.f32 %v1043_v23, %v2471_v47  ;;  %v1108_v63 = vmax.f32 %v1042_v53, 0.0  ;;  %v2783_v47 = vld [vmem:[#allocation3_spill] sm:$0xff]  ;;  %v1089_v53 = vmax.f32 %v994_v42, 0.0  ;;  %v1133_v25 = vpack.c.bf16 %v1093_v10, %v1091_v3 }
 0x194   : > { %v1014_v41 = vadd.f32 %v1013_v0, %v2783_v47  ;;  %v1012_v8 = vadd.f32 %v1011_v38, %v2783_v47  ;;  %v1008_v0 = vadd.f32 %v1007_v22, %v2784_v20  ;;  %v1136_v38 = vpack.c.bf16 %v1100_v43, %v1098_v55  ;;  %v2656_v47 = vpop.permute.xlu0 %1236 }
 0x195   : > { %v1109_v14 = vmax.f32 %v1044_v62, 0.0  ;;  %v1140_v36 = vpack.c.bf16 %v1108_v63, %v1106_v49  ;;  %v998_v22 = vadd.f32 %v2561_v7, %v2786_v12  ;;  %v1087_v7 = vmax.f32 %v990_v37, 0.0  ;;  %v1979_v49 = vld [vmem:[%s2762_s3 + $0x64] ss:$8 sps:$4 sm:$0xff]  }
 0x196   : > { %v1097_v15 = vmax.f32 %v1014_v41, 0.0  ;;  %v1096_v21 = vmax.f32 %v1012_v8, 0.0  ;;  %v1094_v27 = vmax.f32 %v1008_v0, 0.0  ;;  %v1130_v63 = vpack.c.bf16 %v1088_v18, %v1086_v33 }
 0x197   : > { %v1141_v45 = vpack.c.bf16 %v1109_v14, %v1107_v44  ;;  %v1090_v23 = vmax.f32 %v998_v22, 0.0  ;;  %v1131_v48 = vpack.c.bf16 %v1089_v53, %v1087_v7  ;;  %v1975_v44 = vld [vmem:[%s2762_s3 + $0x40] ss:$8 sps:$4 sm:$0xff]   ;;  %v1976_v14 = vld [vmem:[%s2762_s3 + $0x54] ss:$8 sps:$4 sm:$0xff]  }
 0x198   : > { %v1135_v24 = vpack.c.bf16 %v1097_v15, %v1095_v9  ;;  %v1134_v28 = vpack.c.bf16 %v1096_v21, %v1094_v27  ;;  %v2660_v52 = vpop.permute.xlu0 %1226 }
 0x199   : > { %1350 = vmatprep.subr.bf16.mxu1 %v1141_v45  ;;  %v1132_v62 = vpack.c.bf16 %v1092_v39, %v1090_v23  ;;  %v1984_v45 = vld [vmem:[%s2762_s3 + $0x70] ss:$8 sps:$4 sm:$0xff]  }
 0x19a   : > { %1351 = vmatpush2.bf16.msra.mxu1 %v1140_v36  ;;  %v2654_v36 = vpop.permute.xlu1 %1251 }
 0x19b   : > { %1352 = vmatprep.subr.bf16.mxu1 %v1139_v11 }
 0x19c   : > { %v2664_v46 = vpop.permute.xlu0 %1216 }
 0x19e   : > { %1353 = vmatpush2.bf16.msra.mxu1 %v1138_v13  ;;  %v2658_v41 = vpop.permute.xlu1 %1241 }
 0x19f   : > { %1354 = vmatprep.subr.bf16.mxu1 %v1137_v40 }
 0x1a0   : > { %v2668_v20 = vpop.permute.xlu0 %1206 }
 0x1a2   : > { %1355 = vmatpush2.bf16.msra.mxu1 %v1136_v38  ;;  %v2662_v11 = vpop.permute.xlu1 %1231 }
 0x1a3   : > { %1356 = vmatprep.subr.bf16.mxu1 %v1135_v24 }
 0x1a4   : > { %v2672_v32 = vpop.permute.xlu0 %1196 }
 0x1a6   : > { %1357 = vmatpush2.bf16.msra.mxu1 %v1134_v28  ;;  %v2666_v16 = vpop.permute.xlu1 %1221 }
 0x1a7   : > { %1358 = vmatprep.subr.bf16.mxu1 %v1133_v25 }
 0x1a8   : > { %v1187_v43 = vpop.permute.xlu0 %1186 }
 0x1aa   : > { %1359 = vmatpush2.bf16.msra.mxu1 %v1132_v62  ;;  %v2670_v50 = vpop.permute.xlu1 %1211 }
 0x1ab   : > { %1360 = vmatprep.subr.bf16.mxu1 %v1131_v48 }
 0x1ac   : > { %v1177_v35 = vpop.permute.xlu0 %1176 }
 0x1ae   : > { %1361 = vmatpush2.bf16.msra.mxu1 %v1130_v63  ;;  %v2674_v8 = vpop.permute.xlu1 %1201 }
 0x1af   : > { %1362 = vmatprep.subr.bf16.mxu1 %v2555_v59  ;;  %v1966_v59 = vld [vmem:[%s2762_s3 + $0x10] ss:$8 sps:$4 sm:$0xff]  }
 0x1b2   : > { %1363 = vmatpush2.bf16.msra.mxu1 %v2549_v5  ;;  %v1970_v5 = vld [vmem:[%s2762_s3 + $0x34] ss:$8 sps:$4 sm:$0xff]   ;;  %v1192_v13 = vpop.permute.xlu1 %1191 }
 0x1b3   : > { %1364 = vmatprep.subr.bf16.mxu1 %v2531_v4  ;;  %v1967_v4 = vld [vmem:[%s2762_s3 + $0x24] ss:$8 sps:$4 sm:$0xff]  }
 0x1b6   : > { %1365 = vmatpush2.bf16.msra.mxu1 %v2525_v54  ;;  %v1969_v54 = vld [vmem:[%s2762_s3 + $0x20] ss:$8 sps:$4 sm:$0xff]   ;;  %v1182_v0 = vpop.permute.xlu1 %1181 }
 0x1b9   : > { %1367 = vmatmul.mubr.bf16.vlgmr.msra.gmra.mxu1 %v1961_v61 }
 0x1ba   : > { %1376 = vmatprep.mubr.bf16.mxu1 %v1964_v2 }
 0x1c1   : > { %1377 = vmatmul.mubr.bf16.gmra.mxu1 %v1966_v59 }
 0x1c2   : > { %1386 = vmatprep.mubr.bf16.mxu1 %v1967_v4 }
 0x1c9   : > { %1387 = vmatmul.mubr.bf16.gmra.mxu1 %v1969_v54 }
 0x1ca   : > { %1396 = vmatprep.mubr.bf16.mxu1 %v1970_v5 }
 0x1d1   : > { %1397 = vmatmul.mubr.bf16.gmra.mxu1 %v1972_v19 }
 0x1d2   : > { %1406 = vmatprep.mubr.bf16.mxu1 %v1973_v31 }
 0x1d9   : > { %1407 = vmatmul.mubr.bf16.gmra.mxu1 %v1975_v44 }
 0x1da   : > { %1416 = vmatprep.mubr.bf16.mxu1 %v1976_v14 }
 0x1e1   : > { %1417 = vmatmul.mubr.bf16.gmra.mxu1 %v1978_v6 }
 0x1e2   : > { %1426 = vmatprep.mubr.bf16.mxu1 %v1979_v49 }
 0x1e9   : > { %1427 = vmatmul.mubr.bf16.gmra.mxu1 %v1981_v29 }
 0x1ea   : > { %1436 = vmatprep.mubr.bf16.mxu1 %v1982_v26 }
 0x1f1   : > { %1437 = vmatmul.mubr.bf16.gmra.mxu1 %v1984_v45 }
 0x1f2   : > { %1607 = vmatprep.mubr.bf16.mxu1 %v2789_v30 }
 0x279   : > { %v1368_v58 = vpop.f32.mrf.mxu1 }
 0x27a   : > { %v1369_v40 = vadd.f32 %v1368_v58, %v1177_v35 }
 0x27b   : > { %v1370_v15 = vpop.f32.mrf.mxu1 }
 0x27c   : > { %v1371_v12 = vadd.f32 %v1370_v15, %v1177_v35  ;;  %v1447_v51 = vmax.f32 %v1369_v40, 0.0 }
 0x27d   : > { %v1372_v55 = vpop.f32.mrf.mxu1 }
 0x27e   : > { %v1373_v56 = vadd.f32 %v1372_v55, %v1182_v0  ;;  %v1448_v42 = vmax.f32 %v1371_v12, 0.0 }
 0x27f   : > { %v1374_v9 = vpop.f32.mrf.mxu1 }
 0x280   : > { %v1449_v21 = vmax.f32 %v1373_v56, 0.0  ;;  %v1375_v38 = vadd.f32 %v1374_v9, %v1182_v0 }
 0x281   : > { %v1378_v57 = vpop.f32.mrf.mxu1 }
 0x282   : > { %v2676_v10 = vpack.c.bf16 %v1449_v21, %v1447_v51  ;;  %v1450_v24 = vmax.f32 %v1375_v38, 0.0  ;;  %v1379_v60 = vadd.f32 %v1378_v57, %v1187_v43 }
 0x283   : > { %v1380_v22 = vpop.f32.mrf.mxu1 }
 0x284   : > { %v2678_v27 = vpack.c.bf16 %v1450_v24, %v1448_v42  ;;  %v1381_v3 = vadd.f32 %v1380_v22, %v1187_v43  ;;  %v1451_v28 = vmax.f32 %v1379_v60, 0.0 }
 0x285   : > { %v1382_v37 = vpop.f32.mrf.mxu1 }
 0x286   : > { %v1383_v17 = vadd.f32 %v1382_v37, %v1192_v13  ;;  %v1452_v23 = vmax.f32 %v1381_v3, 0.0 }
 0x287   : > { %v1384_v39 = vpop.f32.mrf.mxu1 }
 0x288   : > { %v1453_v53 = vmax.f32 %v1383_v17, 0.0  ;;  %v1385_v25 = vadd.f32 %v1384_v39, %v1192_v13 }
 0x289   : > { %v2680_v1 = vpop.f32.mrf.mxu1 }
 0x28a   : > { %v2682_v7 = vpack.c.bf16 %v1453_v53, %v1451_v28  ;;  %v1454_v18 = vmax.f32 %v1385_v25, 0.0 }
 0x28b   : > { %v2684_v62 = vpop.f32.mrf.mxu1 }
 0x28c   : > { %v2686_v48 = vpack.c.bf16 %v1454_v18, %v1452_v23 }
 0x28d   : > { %v2688_v33 = vpop.f32.mrf.mxu1 }
 0x28f   : > { %v2690_v63 = vpop.f32.mrf.mxu1 }
 0x291   : > { %v2692_v61 = vpop.f32.mrf.mxu1 }
 0x293   : > { %v1400_v2 = vpop.f32.mrf.mxu1 }
 0x295   : > { %v1402_v59 = vpop.f32.mrf.mxu1 }
 0x297   : > { %v1404_v4 = vpop.f32.mrf.mxu1 }
 0x299   : > { %v1408_v54 = vpop.f32.mrf.mxu1 }
 0x29b   : > { %v1410_v5 = vpop.f32.mrf.mxu1 }
 0x29d   : > { %v1412_v19 = vpop.f32.mrf.mxu1 }
 0x29f   : > { %v1414_v31 = vpop.f32.mrf.mxu1 }
 0x2a1   : > { %v1418_v44 = vpop.f32.mrf.mxu1 }
 0x2a2   : > { %v1419_v25 = vadd.f32 %v1418_v44, %v2660_v52 }
 0x2a3   : > { %v1420_v14 = vpop.f32.mrf.mxu1 }
 0x2a4   : > { %v1421_v37 = vadd.f32 %v1420_v14, %v2660_v52  ;;  %v1413_v14 = vadd.f32 %v1412_v19, %v2666_v16  ;;  %v1401_v52 = vadd.f32 %v1400_v2, %v2668_v20 }
 0x2a5   : > { %v1422_v6 = vpop.f32.mrf.mxu1 }
 0x2a6   : > { %v1423_v17 = vadd.f32 %v1422_v6, %v2662_v11  ;;  %v1468_v18 = vmax.f32 %v1421_v37, 0.0  ;;  %v1460_v2 = vmax.f32 %v1401_v52, 0.0 }
 0x2a7   : > { %v1424_v49 = vpop.f32.mrf.mxu1 }
 0x2a8   : > { %v1425_v38 = vadd.f32 %v1424_v49, %v2662_v11  ;;  %v1469_v49 = vmax.f32 %v1423_v17, 0.0  ;;  %v1405_v11 = vadd.f32 %v1404_v4, %v2670_v50  ;;  %v1399_v4 = vadd.f32 %v2692_v61, %v2668_v20 }
 0x2a9   : > { %v1428_v29 = vpop.f32.mrf.mxu1 }
 0x2aa   : > { %v1429_v22 = vadd.f32 %v1428_v29, %v2656_v47  ;;  %v1462_v19 = vmax.f32 %v1405_v11, 0.0 }
 0x2ab   : > { %v1430_v26 = vpop.f32.mrf.mxu1 }
 0x2ac   : > { %v1431_v56 = vadd.f32 %v1430_v26, %v2656_v47  ;;  %v1471_v23 = vmax.f32 %v1429_v22, 0.0  ;;  %v1411_v47 = vadd.f32 %v1410_v5, %v2664_v46  ;;  %v1403_v5 = vadd.f32 %v1402_v59, %v2670_v50  ;;  %v1544_v22 = vpop.permute.xlu0 %1543 }
 0x2ad   : > { %v1432_v45 = vpop.f32.mrf.mxu1  ;;  %v1393_v50 = vadd.f32 %v2688_v33, %v2674_v8 }
 0x2ae   : > { %v1433_v51 = vadd.f32 %v1432_v45, %v2658_v41  ;;  %v1472_v3 = vmax.f32 %v1431_v56, 0.0  ;;  %v1467_v45 = vmax.f32 %v1419_v25, 0.0  ;;  %v1464_v44 = vmax.f32 %v1411_v47, 0.0 }
 0x2af   : > { %v1434_v43 = vpop.f32.mrf.mxu1  ;;  %v1461_v59 = vmax.f32 %v1403_v5, 0.0  ;;  %v1457_v61 = vmax.f32 %v1393_v50, 0.0 }
 0x2b0   : > { %v1435_v15 = vadd.f32 %v1434_v43, %v2658_v41  ;;  %v1473_v39 = vmax.f32 %v1433_v51, 0.0  ;;  %v1470_v41 = vmax.f32 %v1425_v38, 0.0  ;;  %v1465_v43 = vmax.f32 %v1413_v14, 0.0  ;;  %v1534_v17 = vpop.permute.xlu0 %1533 }
 0x2b1   : > { %v1438_v13 = vpop.f32.mrf.mxu1 }
 0x2b2   : > { %v1439_v55 = vadd.f32 %v1438_v13, %v2652_v34  ;;  %v1474_v57 = vmax.f32 %v1435_v15, 0.0  ;;  %v1491_v29 = vpack.c.bf16 %v1473_v39, %v1471_v23  ;;  %v1490_v26 = vpack.c.bf16 %v1470_v41, %v1468_v18 }
 0x2b3   : > { %v1440_v58 = vpop.f32.mrf.mxu1  ;;  %v1489_v13 = vpack.c.bf16 %v1469_v49, %v1467_v45 }
 0x2b4   : > { %v1441_v40 = vadd.f32 %v1440_v58, %v2652_v34  ;;  %v1475_v60 = vmax.f32 %v1439_v55, 0.0  ;;  %v1492_v53 = vpack.c.bf16 %v1474_v57, %v1472_v3  ;;  %v1524_v14 = vpop.permute.xlu0 %1523 }
 0x2b5   : > { %v1442_v35 = vpop.f32.mrf.mxu1 }
 0x2b6   : > { %v1443_v0 = vadd.f32 %v1442_v35, %v2654_v36  ;;  %v1476_v42 = vmax.f32 %v1441_v40, 0.0  ;;  %v1486_v40 = vpack.c.bf16 %v1462_v19, %v1460_v2 }
 0x2b7   : > { %v1444_v12 = vpop.f32.mrf.mxu1 }
 0x2b8   : > { %v1445_v9 = vadd.f32 %v1444_v12, %v2654_v36  ;;  %v1477_v21 = vmax.f32 %v1443_v0, 0.0  ;;  %v1415_v36 = vadd.f32 %v1414_v31, %v2666_v16  ;;  %v1409_v31 = vadd.f32 %v1408_v54, %v2664_v46  ;;  %v1514_v2 = vpop.permute.xlu0 %1513 }
 0x2b9   : > { %v1395_v16 = vadd.f32 %v2690_v63, %v2674_v8  ;;  %v1391_v46 = vadd.f32 %v2684_v62, %v2672_v32  ;;  %v1389_v63 = vadd.f32 %v2680_v1, %v2672_v32  ;;  %v1459_v0 = vmax.f32 %v1399_v4, 0.0  ;;  %v1985_v32 = vld [vmem:[%s2764_s5] sm:$0xff]   ;;  %v1986_v8 = vld [vmem:[%s2764_s5 + $0x8] sm:$0xff]  }
 0x2ba   : > { %v1478_v24 = vmax.f32 %v1445_v9, 0.0  ;;  %v1493_v28 = vpack.c.bf16 %v1477_v21, %v1475_v60  ;;  %v1466_v6 = vmax.f32 %v1415_v36, 0.0  ;;  %v1463_v35 = vmax.f32 %v1409_v31, 0.0 }
 0x2bb   : > { %v1458_v15 = vmax.f32 %v1395_v16, 0.0  ;;  %v1456_v20 = vmax.f32 %v1391_v46, 0.0  ;;  %v1485_v55 = vpack.c.bf16 %v1461_v59, %v1459_v0  ;;  %v1455_v62 = vmax.f32 %v1389_v63, 0.0 }
 0x2bc   : > { %v1494_v34 = vpack.c.bf16 %v1478_v24, %v1476_v42  ;;  %v1488_v58 = vpack.c.bf16 %v1466_v6, %v1464_v44  ;;  %v1487_v54 = vpack.c.bf16 %v1465_v43, %v1463_v35  ;;  %v1549_v42 = vpop.permute.xlu1 %1548 }
 0x2bd   : > { %v1484_v12 = vpack.c.bf16 %v1458_v15, %v1456_v20  ;;  %v1483_v56 = vpack.c.bf16 %v1457_v61, %v1455_v62 }
 0x2be   : > { %1575 = vmatprep.subr.bf16.mxu1 %v1494_v34 }
 0x2bf   : > { %1576 = vmatpush1.bf16.msra.mxu1 %v1493_v28 }
 0x2c0   : > { %1577 = vmatprep.subr.bf16.mxu1 %v1492_v53  ;;  %v1539_v3 = vpop.permute.xlu1 %1538 }
 0x2c3   : > { %1578 = vmatpush1.bf16.msra.mxu1 %v1491_v29 }
 0x2c4   : > { %1579 = vmatprep.subr.bf16.mxu1 %v1490_v26  ;;  %v1529_v53 = vpop.permute.xlu1 %1528 }
 0x2c7   : > { %1580 = vmatpush1.bf16.msra.mxu1 %v1489_v13 }
 0x2c8   : > { %1581 = vmatprep.subr.bf16.mxu1 %v1488_v58  ;;  %v1519_v13 = vpop.permute.xlu1 %1518 }
 0x2cb   : > { %1582 = vmatpush1.bf16.msra.mxu1 %v1487_v54 }
 0x2cc   : > { %1583 = vmatprep.subr.bf16.mxu1 %v1486_v40 }
 0x2cf   : > { %1584 = vmatpush1.bf16.msra.mxu1 %v1485_v55 }
 0x2d0   : > { %1585 = vmatprep.subr.bf16.mxu1 %v1484_v12 }
 0x2d3   : > { %1586 = vmatpush1.bf16.msra.mxu1 %v1483_v56 }
 0x2d4   : > { %1587 = vmatprep.subr.bf16.mxu1 %v2686_v48 }
 0x2d7   : > { %1588 = vmatpush1.bf16.msra.mxu1 %v2682_v7 }
 0x2d8   : > { %1589 = vmatprep.subr.bf16.mxu1 %v2678_v27  ;;  %v1987_v27 = vld [vmem:[%s2764_s5 + $0x10] sm:$0xff]  }
 0x2db   : > { %1590 = vmatpush1.bf16.msra.mxu1 %v2676_v10  ;;  %v1988_v10 = vld [vmem:[%s2764_s5 + $0x18] sm:$0xff]  }
 0x2de   : > { %1608 = vmatmul.mubr.bf16.vlgmr.msra.gmra.mxu1 %v1985_v32 }
 0x2df   : > { %1617 = vmatprep.mubr.bf16.mxu1 %v2789_v30 }
 0x2e6   : > { %1618 = vmatmul.mubr.bf16.gmra.mxu1 %v1986_v8 }
 0x2e7   : > { %1627 = vmatprep.mubr.bf16.mxu1 %v2789_v30 }
 0x2ee   : > { %1628 = vmatmul.mubr.bf16.gmra.mxu1 %v1987_v27 }
 0x2ef   : > { %1637 = vmatprep.mubr.bf16.mxu1 %v2789_v30 }
 0x2f6   : > { %1638 = vmatmul.mubr.bf16.gmra.mxu1 %v1988_v10 }
 0x2f7   : > { %1709 = vmatprep.mubr.bf16.mxu1 %v2789_v30 }
 0x39e   : > { %v1609_v1 = vpop.f32.mrf.mxu1 }
 0x39f   : > { %v1610_v55 = vadd.f32 %v1609_v1, %v1514_v2  ;;  %v1722_v1 = vpop.permute.xlu0 %1721 }
 0x3a0   : > { %v1611_v7 = vpop.f32.mrf.mxu1 }
 0x3a1   : > { %v1612_v54 = vadd.f32 %v1611_v7, %v1514_v2  ;;  %v1648_v27 = vmax.f32 %v1610_v55, 0.0  ;;  %v1672_v7 = vld [vmem:[%s2766_s7] sm:$0xf] }
 0x3a2   : > { %v1613_v48 = vpop.f32.mrf.mxu1 }
 0x3a3   : > { %v1614_v40 = vadd.f32 %v1613_v48, %v1519_v13  ;;  %v1649_v62 = vmax.f32 %v1612_v54, 0.0 }
 0x3a4   : > { %v1615_v33 = vpop.f32.mrf.mxu1 }
 0x3a5   : > { %v1616_v4 = vadd.f32 %v1615_v33, %v1519_v13  ;;  %v1650_v56 = vmax.f32 %v1614_v40, 0.0 }
 0x3a6   : > { %v1619_v9 = vpop.f32.mrf.mxu1 }
 0x3a7   : > { %v1620_v50 = vadd.f32 %v1619_v9, %v1524_v14  ;;  %v1651_v20 = vmax.f32 %v1616_v4, 0.0  ;;  %v1664_v10 = vpack.c.bf16 %v1650_v56, %v1648_v27 }
 0x3a8   : > { %v1621_v51 = vpop.f32.mrf.mxu1 }
 0x3a9   : > { %v1622_v44 = vadd.f32 %v1621_v51, %v1524_v14  ;;  %v1652_v12 = vmax.f32 %v1620_v50, 0.0  ;;  %v1665_v8 = vpack.c.bf16 %v1651_v20, %v1649_v62 }
 0x3aa   : > { %v1623_v21 = vpop.f32.mrf.mxu1 }
 0x3ab   : > { %v1624_v16 = vadd.f32 %v1623_v21, %v1529_v53  ;;  %v1653_v15 = vmax.f32 %v1622_v44, 0.0 }
 0x3ac   : > { %v1625_v38 = vpop.f32.mrf.mxu1 }
 0x3ad   : > { %v1626_v11 = vadd.f32 %v1625_v38, %v1529_v53  ;;  %v1654_v63 = vmax.f32 %v1624_v16, 0.0 }
 0x3ae   : > { %v1629_v57 = vpop.f32.mrf.mxu1 }
 0x3af   : > { %v1630_v45 = vadd.f32 %v1629_v57, %v1534_v17  ;;  %v1655_v35 = vmax.f32 %v1626_v11, 0.0  ;;  %v1666_v32 = vpack.c.bf16 %v1654_v63, %v1652_v12 }
 0x3b0   : > { %v1631_v24 = vpop.f32.mrf.mxu1 }
 0x3b1   : > { %v1632_v47 = vadd.f32 %v1631_v24, %v1534_v17  ;;  %v1656_v59 = vmax.f32 %v1630_v45, 0.0  ;;  %v1667_v61 = vpack.c.bf16 %v1655_v35, %v1653_v15 }
 0x3b2   : > { %v1633_v60 = vpop.f32.mrf.mxu1 }
 0x3b3   : > { %v1634_v49 = vadd.f32 %v1633_v60, %v1539_v3  ;;  %v1657_v5 = vmax.f32 %v1632_v47, 0.0 }
 0x3b4   : > { %v1635_v37 = vpop.f32.mrf.mxu1 }
 0x3b5   : > { %v1636_v30 = vadd.f32 %v1635_v37, %v1539_v3  ;;  %v1658_v19 = vmax.f32 %v1634_v49, 0.0 }
 0x3b6   : > { %v1639_v34 = vpop.f32.mrf.mxu1 }
 0x3b7   : > { %v1640_v25 = vadd.f32 %v1639_v34, %v1544_v22  ;;  %v1659_v6 = vmax.f32 %v1636_v30, 0.0  ;;  %v1668_v0 = vpack.c.bf16 %v1658_v19, %v1656_v59 }
 0x3b8   : > { %v1641_v39 = vpop.f32.mrf.mxu1 }
 0x3b9   : > { %v1642_v36 = vadd.f32 %v1641_v39, %v1544_v22  ;;  %v1660_v52 = vmax.f32 %v1640_v25, 0.0  ;;  %v1669_v46 = vpack.c.bf16 %v1659_v6, %v1657_v5 }
 0x3ba   : > { %v1643_v28 = vpop.f32.mrf.mxu1 }
 0x3bb   : > { %v1644_v41 = vadd.f32 %v1643_v28, %v1549_v42  ;;  %v1661_v26 = vmax.f32 %v1642_v36, 0.0 }
 0x3bc   : > { %v1645_v23 = vpop.f32.mrf.mxu1 }
 0x3bd   : > { %v1646_v18 = vadd.f32 %v1645_v23, %v1549_v42  ;;  %v1662_v29 = vmax.f32 %v1644_v41, 0.0 }
 0x3bf   : > { %v1663_v31 = vmax.f32 %v1646_v18, 0.0  ;;  %v1670_v58 = vpack.c.bf16 %v1662_v29, %v1660_v52 }
 0x3c1   : > { %v1671_v43 = vpack.c.bf16 %v1663_v31, %v1661_v26 }
 0x3c3   : > { %1685 = vmatprep.subr.bf16.mxu1 %v1671_v43 }
 0x3c4   : > { %1686 = vmatpush1.bf16.msra.mxu1 %v1670_v58 }
 0x3c5   : > { %1687 = vmatprep.subr.bf16.mxu1 %v1669_v46 }
 0x3c8   : > { %1688 = vmatpush1.bf16.msra.mxu1 %v1668_v0 }
 0x3c9   : > { %1689 = vmatprep.subr.bf16.mxu1 %v1667_v61 }
 0x3cc   : > { %1690 = vmatpush1.bf16.msra.mxu1 %v1666_v32 }
 0x3cd   : > { %1691 = vmatprep.subr.bf16.mxu1 %v1665_v8 }
 0x3d0   : > { %1692 = vmatpush1.bf16.msra.mxu1 %v1664_v10 }
 0x3d3   : > { %1881 = vmatmul.mubr.msk.bf16.vlgmr.msra.gmra.mxu1 %vm1673_vm0, %v1672_v7 }
 0x493   : > { %v1711_v48 = vpop.f32.mrf.mxu1 }
 0x494   : > { %v1724_v33 = vadd.f32 %v1722_v1, %v1711_v48 }
 0x495   : > { %v1713_v9 = vpop.f32.mrf.mxu1 }
 0x496   : > { %v1725_v51 = vadd.f32 %v1722_v1, %v1713_v9  ;;  %1989 = vtanh.f32 %v1724_v33 }
 0x497   : > { %v1715_v21 = vpop.f32.mrf.mxu1 }
 0x498   : > { %1991 = vtanh.f32 %v1725_v51 }
 0x499   : > { %v1716_v38 = vpop.f32.mrf.mxu1 }
 0x4a3   : > { %v1990_v57 = vpop.eup %1989 }
 0x4a5   : > { %v1992_v42 = vpop.eup %1991 }
 0x4a6   : > { %v1730_v24 = vcombine.low %v1990_v57, %v1992_v42 }
 0x4a8   : > { %1732 = vst [vmem:[%s370_s21] sm:$0x77] %v1730_v24 }
 0x4a9 PF: > { %s19_s11 = sadd.s32 1, %s2015_s11   ;;  %s2790_s30 = smov %s2011_s10 }
 0x4aa   : > { %p16_p5 = scmp.ge.s32.totalorder %s19_s11, 4   ;;  %s2791_s10 = smov %s2793_s12 }
 0x4ac   :  { %18 = sbr.rel (!%p16_p5) target bundleno = 2 (0x2), region = 86 }

</bundles_post_ra>
